<compile_context>
chip_gen: v7x
topology: tpu7x:2x2x1
jax: 0.10.0
libtpu: 0.0.40
codegen_flags: <defaults>
</compile_context>

<pallas_src>
import jax
import jax.numpy as jnp
from jax import lax
from jax.experimental import pallas as pl
from jax.experimental.pallas import tpu as pltpu


def _bn_fold(gamma, beta, mean, var, eps=1e-5):
    scale = gamma / jnp.sqrt(var + eps)
    bias = beta - mean * scale
    return scale, bias


def bottleneck_block_pallas(x, params, *, group, stride=1):
    assert stride == 1, "only stride=1 is implemented"
    f32 = jnp.float32
    bf16 = jnp.bfloat16
    B, Cin, H, W = x.shape
    HW = H * W
    planes = params["w2"].shape[0]
    out_planes = params["w3"].shape[0]
    cg = Cin // group          # conv1 input channels per group
    pg = planes // group       # conv1 output / conv3 input channels per group
    og = out_planes // group   # conv3 output channels per group

    # ---- fold BN (eval mode) to per-channel scale/bias ----
    s1, b1 = _bn_fold(*params["bn1"])
    s2, b2 = _bn_fold(*params["bn2"])
    s3, b3 = _bn_fold(*params["bn3"])
    sp, bp = _bn_fold(*params["bnp"])

    # ---- conv1: block-diagonal (Cin, planes); bn1 scale folded into columns;
    #      channel shuffle folded by permuting the output columns (+ bias) ----
    w1_ = params["w1"].reshape(planes, cg).astype(f32)
    w1m = jnp.zeros((Cin, planes), f32)
    for g in range(group):
        w1m = w1m.at[g * cg:(g + 1) * cg, g * pg:(g + 1) * pg].set(
            w1_[g * pg:(g + 1) * pg, :].T)
    w1m = w1m * s1[None, :]
    perm = jnp.array([(j % group) * pg + j // group for j in range(planes)])
    w1s = w1m[:, perm].astype(bf16)
    b1p = b1[perm].reshape(1, planes).astype(f32)

    # ---- conv2 depthwise taps (9, planes) with bn2 scale folded in ----
    w2s = (params["w2"].reshape(planes, 9).T.astype(f32) * s2[None, :]).astype(f32)
    b2p = b2.reshape(1, 1, planes).astype(f32)

    # ---- conv3: block-diagonal (planes, out_planes) * s3; pass_by (Cin, out_planes) * sp;
    #      biases merged ----
    w3_ = params["w3"].reshape(out_planes, pg).astype(f32)
    w3m = jnp.zeros((planes, out_planes), f32)
    for g in range(group):
        w3m = w3m.at[g * pg:(g + 1) * pg, g * og:(g + 1) * og].set(
            w3_[g * og:(g + 1) * og, :].T)
    w3s = (w3m * s3[None, :]).astype(bf16)
    wps = (params["wp"].reshape(out_planes, Cin).T.astype(f32) * sp[None, :]).astype(bf16)
    b3c = (b3 + bp).reshape(1, out_planes).astype(f32)

    # channels-last, flattened spatial, bf16 activations in HBM
    x_flat = jnp.transpose(x, (0, 2, 3, 1)).reshape(B, HW, Cin).astype(bf16)

    # Scratch width: columns [0, W) hold data, [W, Wp) stay zero and serve as the right
    # halo; the circular roll wrap turns column Wp-1 into the left halo.  Rounding to a
    # sublane multiple keeps the interior store and the row-window loads unmasked.
    Wp = ((W + 1 + 7) // 8) * 8

    def fused_kernel(x_ref, w1_ref, b1_ref, w2_ref, b2_ref,
                     w3_ref, wp_ref, b3_ref, o_ref, ypad_ref):
        # Zero the halo scratch ONCE; it persists across grid steps and the interior is
        # fully rewritten every step (halo rows/cols are never written afterwards).
        # Requires sequential visitation of the batch axis (dimension_semantics below).
        @pl.when(pl.program_id(0) == 0)
        def _():
            ypad_ref[...] = jnp.zeros_like(ypad_ref)

        xv = x_ref[0]                                              # (HW, Cin) bf16

        # conv1 (grouped 1x1, shuffle + bn1 scale folded into columns) + bias + relu
        y1 = jnp.dot(xv, w1_ref[...], preferred_element_type=jnp.float32)
        y1 = jnp.maximum(y1 + b1_ref[...], 0.0)                    # (HW, planes) f32

        # stage y1 into the zero-padded VMEM scratch: sublane-aligned, unmasked store
        ypad_ref[1:H + 1, 0:W, :] = y1.reshape(H, W, planes)

        # 3x3 depthwise conv (bn2 scale folded into the taps) + bias + relu.
        # 3 aligned full-width row-window loads (one per dy); the +/-1 column shifts are
        # XLU rolls whose circular wrap pulls in the zero halo columns; the subsequent
        # [:, 0:W, :] slice is aligned.  Taps hoisted; acc seeded with the first product.
        taps = w2_ref[...]                                         # (9, planes) f32
        acc = None
        for dy in range(3):
            win = ypad_ref[dy:dy + H, :, :]                        # (H, Wp, planes) f32
            for dx in range(3):
                shift = (1 - dx) % Wp                              # +1, 0, Wp-1 (== -1)
                shifted = win if shift == 0 else pltpu.roll(win, shift=shift, axis=1)
                k = dy * 3 + dx
                tap = taps[k:k + 1, :].reshape(1, 1, planes)
                contrib = shifted[:, 0:W, :] * tap
                acc = contrib if acc is None else acc + contrib
        y2 = jnp.maximum(acc + b2_ref[...], 0.0)                   # (H, W, planes) f32

        # conv3 (grouped 1x1, bn3 scale folded) + pass_by (1x1, bnp scale folded),
        # single merged bias.  Two bf16 dots into one f32 accumulator.
        # TODO(synk): stack [w3; wp] and stage [y2 | x] for a single MXU dot at
        #             production channel counts.
        z = jnp.dot(y2.reshape(HW, planes).astype(jnp.bfloat16), w3_ref[...],
                    preferred_element_type=jnp.float32)
        z = z + jnp.dot(xv, wp_ref[...], preferred_element_type=jnp.float32)
        o_ref[0] = z + b3_ref[...]

    out_flat = pl.pallas_call(
        fused_kernel,
        out_shape=jax.ShapeDtypeStruct((B, HW, out_planes), f32),
        grid=(B,),
        in_specs=[
            pl.BlockSpec((1, HW, Cin), lambda b: (b, 0, 0)),
            pl.BlockSpec((Cin, planes), lambda b: (0, 0)),
            pl.BlockSpec((1, planes), lambda b: (0, 0)),
            pl.BlockSpec((9, planes), lambda b: (0, 0)),
            pl.BlockSpec((1, 1, planes), lambda b: (0, 0, 0)),
            pl.BlockSpec((planes, out_planes), lambda b: (0, 0)),
            pl.BlockSpec((Cin, out_planes), lambda b: (0, 0)),
            pl.BlockSpec((1, out_planes), lambda b: (0, 0)),
        ],
        out_specs=pl.BlockSpec((1, HW, out_planes), lambda b: (b, 0, 0)),
        scratch_shapes=[pltpu.VMEM((H + 2, Wp, planes), jnp.float32)],
        compiler_params=pltpu.CompilerParams(
            # "arbitrary": sequential in-order visitation so the zero-once halo init is
            # valid even on 2-TensorCore parts (a "parallel" split would skip program_id 0
            # on the second core).  With an HW tile axis (TODO) that axis becomes the
            # "parallel" one.
            dimension_semantics=("arbitrary",),
            vmem_limit_bytes=32 * 1024 * 1024),
    )(x_flat, w1s, b1p, w2s, b2p, w3s, wps, b3c)

    return out_flat.reshape(B, H, W, out_planes).transpose(0, 3, 1, 2)


# ---------------------------- pure-JAX reference ----------------------------
def bottleneck_block_ref(x, params, *, group, stride=1):
    eps = 1e-5
    dn = ("NCHW", "OIHW", "NCHW")

    def bn(y, p):
        gamma, beta, mean, var = p
        inv = 1.0 / jnp.sqrt(var + eps)
        return (y - mean[None, :, None, None]) * inv[None, :, None, None] * \
            gamma[None, :, None, None] + beta[None, :, None, None]

    planes = params["w2"].shape[0]
    out = lax.conv_general_dilated(x, params["w1"], (1, 1), "VALID",
                                   dimension_numbers=dn, feature_group_count=group)
    out = jax.nn.relu(bn(out, params["bn1"]))
    b, c, h, w = out.shape
    out = out.reshape(b, group, c // group, h, w).transpose(0, 2, 1, 3, 4).reshape(b, c, h, w)
    out = lax.conv_general_dilated(out, params["w2"], (stride, stride), ((1, 1), (1, 1)),
                                   dimension_numbers=dn, feature_group_count=planes)
    out = jax.nn.relu(bn(out, params["bn2"]))
    out = lax.conv_general_dilated(out, params["w3"], (1, 1), "VALID",
                                   dimension_numbers=dn, feature_group_count=group)
    out = bn(out, params["bn3"])
    if stride == 1:
        res = lax.conv_general_dilated(x, params["wp"], (1, 1), "VALID",
                                       dimension_numbers=dn)
        out = out + bn(res, params["bnp"])
    return out


def init_params(key, in_planes, out_planes, group):
    planes = out_planes // 4
    keys = jax.random.split(key, 8)

    def bn_params(k, c):
        k1, k2, k3, k4 = jax.random.split(k, 4)
        gamma = 1.0 + 0.1 * jax.random.normal(k1, (c,), jnp.float32)
        beta = 0.1 * jax.random.normal(k2, (c,), jnp.float32)
        mean = 0.1 * jax.random.normal(k3, (c,), jnp.float32)
        var = jax.random.uniform(k4, (c,), jnp.float32, minval=0.5, maxval=1.5)
        return (gamma, beta, mean, var)

    return {
        "w1": 0.3 * jax.random.normal(keys[0], (planes, in_planes // group, 1, 1), jnp.float32),
        "bn1": bn_params(keys[1], planes),
        "w2": 0.3 * jax.random.normal(keys[2], (planes, 1, 3, 3), jnp.float32),
        "bn2": bn_params(keys[3], planes),
        "w3": 0.3 * jax.random.normal(keys[4], (out_planes, planes // group, 1, 1), jnp.float32),
        "bn3": bn_params(keys[5], out_planes),
        "wp": 0.3 * jax.random.normal(keys[6], (out_planes, in_planes, 1, 1), jnp.float32),
        "bnp": bn_params(keys[7], out_planes),
    }


if __name__ == "__main__":
    key = jax.random.PRNGKey(0)
    kp, kx = jax.random.split(key)

    B, in_planes, out_planes, group, H, W = 2, 8, 16, 2, 16, 16
    params = init_params(kp, in_planes, out_planes, group)
    x = jax.random.normal(kx, (B, in_planes, H, W), jnp.float32)

    out = bottleneck_block_pallas(x, params, group=group, stride=1)
    out = jax.block_until_ready(out)

    ref = bottleneck_block_ref(x, params, group=group, stride=1)
    assert out.shape == ref.shape, (out.shape, ref.shape)
    max_err = float(jnp.max(jnp.abs(out - ref)))
    # bf16 activations/weights on the MXU (f32 accumulation) -> slightly looser tolerance
    assert jnp.allclose(out, ref, rtol=2e-2, atol=2e-2), f"max abs err {max_err}"

    print("KERNEL_OK")
</pallas_src>

<mosaic_0001>
module attributes {stable_mosaic.version = 11 : i64} {
  func.func @fused_kernel(%arg0: i32, %arg1: memref<1x256x8xbf16, #tpu.memory_space<vmem>>, %arg2: memref<8x4xbf16, #tpu.memory_space<vmem>>, %arg3: memref<1x4xf32, #tpu.memory_space<vmem>>, %arg4: memref<9x4xf32, #tpu.memory_space<vmem>>, %arg5: memref<1x1x4xf32, #tpu.memory_space<vmem>>, %arg6: memref<4x16xbf16, #tpu.memory_space<vmem>>, %arg7: memref<8x16xbf16, #tpu.memory_space<vmem>>, %arg8: memref<1x16xf32, #tpu.memory_space<vmem>>, %arg9: memref<1x256x16xf32, #tpu.memory_space<vmem>>, %arg10: memref<18x24x4xf32, #tpu.memory_space<vmem>>) attributes {dimension_semantics = [#tpu.dimension_semantics<arbitrary>], iteration_bounds = array<i64: 2>, scalar_prefetch = 0 : i64, scratch_operands = 1 : i64, tpu.core_type = #tpu.core_type<tc>, window_params = [{transform_indices = @transform_0, window_bounds = array<i64: 1, 256, 8>}, {pipeline_mode = #tpu.pipeline_mode<synchronous>, transform_indices = @transform_1, window_bounds = array<i64: 8, 4>}, {pipeline_mode = #tpu.pipeline_mode<synchronous>, transform_indices = @transform_2, window_bounds = array<i64: 1, 4>}, {pipeline_mode = #tpu.pipeline_mode<synchronous>, transform_indices = @transform_3, window_bounds = array<i64: 9, 4>}, {pipeline_mode = #tpu.pipeline_mode<synchronous>, transform_indices = @transform_4, window_bounds = array<i64: 1, 1, 4>}, {pipeline_mode = #tpu.pipeline_mode<synchronous>, transform_indices = @transform_5, window_bounds = array<i64: 4, 16>}, {pipeline_mode = #tpu.pipeline_mode<synchronous>, transform_indices = @transform_6, window_bounds = array<i64: 8, 16>}, {pipeline_mode = #tpu.pipeline_mode<synchronous>, transform_indices = @transform_7, window_bounds = array<i64: 1, 16>}, {transform_indices = @transform_8, window_bounds = array<i64: 1, 256, 16>}]} {
    %c0_i32 = arith.constant 0 : i32
    %0 = arith.cmpi eq, %arg0, %c0_i32 : i32
    %1 = arith.extui %0 : i1 to i32
    %c0_i32_0 = arith.constant 0 : i32
    %2 = arith.cmpi ne, %1, %c0_i32_0 : i32
    scf.if %2 {
      %cst_39 = arith.constant 0.000000e+00 : f32
      %95 = vector.broadcast %cst_39 : f32 to vector<18x24x4xf32>
      %c0_40 = arith.constant 0 : index
      %c0_41 = arith.constant 0 : index
      %c0_42 = arith.constant 0 : index
      %96 = vector.load %arg10[%c0_40, %c0_41, %c0_42] : memref<18x24x4xf32, #tpu.memory_space<vmem>>, vector<18x24x4xf32>
      tpu.vector_store %arg10[%c0_40, %c0_41, %c0_42], %95 {strides = array<i32>} : memref<18x24x4xf32, #tpu.memory_space<vmem>>, vector<18x24x4xf32>,
    } else {
    }
    %c0 = arith.constant 0 : index
    %c0_1 = arith.constant 0 : index
    %c0_2 = arith.constant 0 : index
    %3 = vector.load %arg1[%c0, %c0_1, %c0_2] : memref<1x256x8xbf16, #tpu.memory_space<vmem>>, vector<1x256x8xbf16>
    %4 = vector.shape_cast %3 : vector<1x256x8xbf16> to vector<256x8xbf16>
    %c0_3 = arith.constant 0 : index
    %c0_4 = arith.constant 0 : index
    %5 = vector.load %arg2[%c0_3, %c0_4] : memref<8x4xbf16, #tpu.memory_space<vmem>>, vector<8x4xbf16>
    %cst = arith.constant dense<0.000000e+00> : vector<256x4xf32>
    %6 = tpu.matmul %4, %5, %cst {dimension_numbers = #tpu.dot_dimension_numbers<[1], [0], [0], [1], [0, 0, 1, 1], [], []>} : vector<256x8xbf16>, vector<8x4xbf16>, vector<256x4xf32> -> vector<256x4xf32>
    %c0_5 = arith.constant 0 : index
    %c0_6 = arith.constant 0 : index
    %7 = vector.load %arg3[%c0_5, %c0_6] : memref<1x4xf32, #tpu.memory_space<vmem>>, vector<1x4xf32>
    %8 = vector.broadcast %7 : vector<1x4xf32> to vector<256x4xf32>
    %9 = arith.addf %6, %8 : vector<256x4xf32>
    %cst_7 = arith.constant 0.000000e+00 : f32
    %10 = vector.broadcast %cst_7 : f32 to vector<256x4xf32>
    %11 = arith.maximumf %9, %10 : vector<256x4xf32>
    %12 = vector.shape_cast %11 : vector<256x4xf32> to vector<16x16x4xf32>
    %c1 = arith.constant 1 : index
    %c0_8 = arith.constant 0 : index
    %c0_9 = arith.constant 0 : index
    %13 = vector.load %arg10[%c1, %c0_8, %c0_9] : memref<18x24x4xf32, #tpu.memory_space<vmem>>, vector<16x16x4xf32>
    tpu.vector_store %arg10[%c1, %c0_8, %c0_9], %12 {strides = array<i32>} : memref<18x24x4xf32, #tpu.memory_space<vmem>>, vector<16x16x4xf32>,
    %c0_10 = arith.constant 0 : index
    %c0_11 = arith.constant 0 : index
    %14 = vector.load %arg4[%c0_10, %c0_11] : memref<9x4xf32, #tpu.memory_space<vmem>>, vector<9x4xf32>
    %c0_12 = arith.constant 0 : index
    %c0_13 = arith.constant 0 : index
    %c0_14 = arith.constant 0 : index
    %15 = vector.load %arg10[%c0_12, %c0_13, %c0_14] : memref<18x24x4xf32, #tpu.memory_space<vmem>>, vector<16x24x4xf32>
    %c1_i32 = arith.constant 1 : i32
    %16 = tpu.dynamic_rotate %15 by %c1_i32 dim 1 : vector<16x24x4xf32>, i32 -> vector<16x24x4xf32>
    %17 = vector.extract_strided_slice %14 {offsets = [0, 0], sizes = [1, 4], strides = [1, 1]} : vector<9x4xf32> to vector<1x4xf32>
    %18 = vector.shape_cast %17 : vector<1x4xf32> to vector<1x1x4xf32>
    %19 = vector.extract_strided_slice %16 {offsets = [0, 0, 0], sizes = [16, 16, 4], strides = [1, 1, 1]} : vector<16x24x4xf32> to vector<16x16x4xf32>
    %20 = vector.broadcast %18 : vector<1x1x4xf32> to vector<16x16x4xf32>
    %21 = arith.mulf %19, %20 : vector<16x16x4xf32>
    %22 = vector.extract_strided_slice %14 {offsets = [1, 0], sizes = [1, 4], strides = [1, 1]} : vector<9x4xf32> to vector<1x4xf32>
    %23 = vector.shape_cast %22 : vector<1x4xf32> to vector<1x1x4xf32>
    %24 = vector.extract_strided_slice %15 {offsets = [0, 0, 0], sizes = [16, 16, 4], strides = [1, 1, 1]} : vector<16x24x4xf32> to vector<16x16x4xf32>
    %25 = vector.broadcast %23 : vector<1x1x4xf32> to vector<16x16x4xf32>
    %26 = arith.mulf %24, %25 : vector<16x16x4xf32>
    %27 = arith.addf %21, %26 : vector<16x16x4xf32>
    %c23_i32 = arith.constant 23 : i32
    %28 = tpu.dynamic_rotate %15 by %c23_i32 dim 1 : vector<16x24x4xf32>, i32 -> vector<16x24x4xf32>
    %29 = vector.extract_strided_slice %14 {offsets = [2, 0], sizes = [1, 4], strides = [1, 1]} : vector<9x4xf32> to vector<1x4xf32>
    %30 = vector.shape_cast %29 : vector<1x4xf32> to vector<1x1x4xf32>
    %31 = vector.extract_strided_slice %28 {offsets = [0, 0, 0], sizes = [16, 16, 4], strides = [1, 1, 1]} : vector<16x24x4xf32> to vector<16x16x4xf32>
    %32 = vector.broadcast %30 : vector<1x1x4xf32> to vector<16x16x4xf32>
    %33 = arith.mulf %31, %32 : vector<16x16x4xf32>
    %34 = arith.addf %27, %33 : vector<16x16x4xf32>
    %c1_15 = arith.constant 1 : index
    %c0_16 = arith.constant 0 : index
    %c0_17 = arith.constant 0 : index
    %35 = vector.load %arg10[%c1_15, %c0_16, %c0_17] : memref<18x24x4xf32, #tpu.memory_space<vmem>>, vector<16x24x4xf32>
    %c1_i32_18 = arith.constant 1 : i32
    %36 = tpu.dynamic_rotate %35 by %c1_i32_18 dim 1 : vector<16x24x4xf32>, i32 -> vector<16x24x4xf32>
    %37 = vector.extract_strided_slice %14 {offsets = [3, 0], sizes = [1, 4], strides = [1, 1]} : vector<9x4xf32> to vector<1x4xf32>
    %38 = vector.shape_cast %37 : vector<1x4xf32> to vector<1x1x4xf32>
    %39 = vector.extract_strided_slice %36 {offsets = [0, 0, 0], sizes = [16, 16, 4], strides = [1, 1, 1]} : vector<16x24x4xf32> to vector<16x16x4xf32>
    %40 = vector.broadcast %38 : vector<1x1x4xf32> to vector<16x16x4xf32>
    %41 = arith.mulf %39, %40 : vector<16x16x4xf32>
    %42 = arith.addf %34, %41 : vector<16x16x4xf32>
    %43 = vector.extract_strided_slice %14 {offsets = [4, 0], sizes = [1, 4], strides = [1, 1]} : vector<9x4xf32> to vector<1x4xf32>
    %44 = vector.shape_cast %43 : vector<1x4xf32> to vector<1x1x4xf32>
    %45 = vector.extract_strided_slice %35 {offsets = [0, 0, 0], sizes = [16, 16, 4], strides = [1, 1, 1]} : vector<16x24x4xf32> to vector<16x16x4xf32>
    %46 = vector.broadcast %44 : vector<1x1x4xf32> to vector<16x16x4xf32>
    %47 = arith.mulf %45, %46 : vector<16x16x4xf32>
    %48 = arith.addf %42, %47 : vector<16x16x4xf32>
    %c23_i32_19 = arith.constant 23 : i32
    %49 = tpu.dynamic_rotate %35 by %c23_i32_19 dim 1 : vector<16x24x4xf32>, i32 -> vector<16x24x4xf32>
    %50 = vector.extract_strided_slice %14 {offsets = [5, 0], sizes = [1, 4], strides = [1, 1]} : vector<9x4xf32> to vector<1x4xf32>
    %51 = vector.shape_cast %50 : vector<1x4xf32> to vector<1x1x4xf32>
    %52 = vector.extract_strided_slice %49 {offsets = [0, 0, 0], sizes = [16, 16, 4], strides = [1, 1, 1]} : vector<16x24x4xf32> to vector<16x16x4xf32>
    %53 = vector.broadcast %51 : vector<1x1x4xf32> to vector<16x16x4xf32>
    %54 = arith.mulf %52, %53 : vector<16x16x4xf32>
    %55 = arith.addf %48, %54 : vector<16x16x4xf32>
    %c2 = arith.constant 2 : index
    %c0_20 = arith.constant 0 : index
    %c0_21 = arith.constant 0 : index
    %56 = vector.load %arg10[%c2, %c0_20, %c0_21] : memref<18x24x4xf32, #tpu.memory_space<vmem>>, vector<16x24x4xf32>
    %c1_i32_22 = arith.constant 1 : i32
    %57 = tpu.dynamic_rotate %56 by %c1_i32_22 dim 1 : vector<16x24x4xf32>, i32 -> vector<16x24x4xf32>
    %58 = vector.extract_strided_slice %14 {offsets = [6, 0], sizes = [1, 4], strides = [1, 1]} : vector<9x4xf32> to vector<1x4xf32>
    %59 = vector.shape_cast %58 : vector<1x4xf32> to vector<1x1x4xf32>
    %60 = vector.extract_strided_slice %57 {offsets = [0, 0, 0], sizes = [16, 16, 4], strides = [1, 1, 1]} : vector<16x24x4xf32> to vector<16x16x4xf32>
    %61 = vector.broadcast %59 : vector<1x1x4xf32> to vector<16x16x4xf32>
    %62 = arith.mulf %60, %61 : vector<16x16x4xf32>
    %63 = arith.addf %55, %62 : vector<16x16x4xf32>
    %64 = vector.extract_strided_slice %14 {offsets = [7, 0], sizes = [1, 4], strides = [1, 1]} : vector<9x4xf32> to vector<1x4xf32>
    %65 = vector.shape_cast %64 : vector<1x4xf32> to vector<1x1x4xf32>
    %66 = vector.extract_strided_slice %56 {offsets = [0, 0, 0], sizes = [16, 16, 4], strides = [1, 1, 1]} : vector<16x24x4xf32> to vector<16x16x4xf32>
    %67 = vector.broadcast %65 : vector<1x1x4xf32> to vector<16x16x4xf32>
    %68 = arith.mulf %66, %67 : vector<16x16x4xf32>
    %69 = arith.addf %63, %68 : vector<16x16x4xf32>
    %c23_i32_23 = arith.constant 23 : i32
    %70 = tpu.dynamic_rotate %56 by %c23_i32_23 dim 1 : vector<16x24x4xf32>, i32 -> vector<16x24x4xf32>
    %71 = vector.extract_strided_slice %14 {offsets = [8, 0], sizes = [1, 4], strides = [1, 1]} : vector<9x4xf32> to vector<1x4xf32>
    %72 = vector.shape_cast %71 : vector<1x4xf32> to vector<1x1x4xf32>
    %73 = vector.extract_strided_slice %70 {offsets = [0, 0, 0], sizes = [16, 16, 4], strides = [1, 1, 1]} : vector<16x24x4xf32> to vector<16x16x4xf32>
    %74 = vector.broadcast %72 : vector<1x1x4xf32> to vector<16x16x4xf32>
    %75 = arith.mulf %73, %74 : vector<16x16x4xf32>
    %76 = arith.addf %69, %75 : vector<16x16x4xf32>
    %c0_24 = arith.constant 0 : index
    %c0_25 = arith.constant 0 : index
    %c0_26 = arith.constant 0 : index
    %77 = vector.load %arg5[%c0_24, %c0_25, %c0_26] : memref<1x1x4xf32, #tpu.memory_space<vmem>>, vector<1x1x4xf32>
    %78 = vector.broadcast %77 : vector<1x1x4xf32> to vector<16x16x4xf32>
    %79 = arith.addf %76, %78 : vector<16x16x4xf32>
    %cst_27 = arith.constant 0.000000e+00 : f32
    %80 = vector.broadcast %cst_27 : f32 to vector<16x16x4xf32>
    %81 = arith.maximumf %79, %80 : vector<16x16x4xf32>
    %82 = vector.shape_cast %81 : vector<16x16x4xf32> to vector<256x4xf32>
    %83 = arith.truncf %82 : vector<256x4xf32> to vector<256x4xbf16>
    %c0_28 = arith.constant 0 : index
    %c0_29 = arith.constant 0 : index
    %84 = vector.load %arg6[%c0_28, %c0_29] : memref<4x16xbf16, #tpu.memory_space<vmem>>, vector<4x16xbf16>
    %cst_30 = arith.constant dense<0.000000e+00> : vector<256x16xf32>
    %85 = tpu.matmul %83, %84, %cst_30 {dimension_numbers = #tpu.dot_dimension_numbers<[1], [0], [0], [1], [0, 0, 1, 1], [], []>} : vector<256x4xbf16>, vector<4x16xbf16>, vector<256x16xf32> -> vector<256x16xf32>
    %c0_31 = arith.constant 0 : index
    %c0_32 = arith.constant 0 : index
    %86 = vector.load %arg7[%c0_31, %c0_32] : memref<8x16xbf16, #tpu.memory_space<vmem>>, vector<8x16xbf16>
    %cst_33 = arith.constant dense<0.000000e+00> : vector<256x16xf32>
    %87 = tpu.matmul %4, %86, %cst_33 {dimension_numbers = #tpu.dot_dimension_numbers<[1], [0], [0], [1], [0, 0, 1, 1], [], []>} : vector<256x8xbf16>, vector<8x16xbf16>, vector<256x16xf32> -> vector<256x16xf32>
    %88 = arith.addf %85, %87 : vector<256x16xf32>
    %c0_34 = arith.constant 0 : index
    %c0_35 = arith.constant 0 : index
    %89 = vector.load %arg8[%c0_34, %c0_35] : memref<1x16xf32, #tpu.memory_space<vmem>>, vector<1x16xf32>
    %90 = vector.broadcast %89 : vector<1x16xf32> to vector<256x16xf32>
    %91 = arith.addf %88, %90 : vector<256x16xf32>
    %c0_36 = arith.constant 0 : index
    %c0_37 = arith.constant 0 : index
    %c0_38 = arith.constant 0 : index
    %92 = vector.load %arg9[%c0_36, %c0_37, %c0_38] : memref<1x256x16xf32, #tpu.memory_space<vmem>>, vector<1x256x16xf32>
    %93 = vector.shape_cast %92 : vector<1x256x16xf32> to vector<256x16xf32>
    %94 = vector.shape_cast %91 : vector<256x16xf32> to vector<1x256x16xf32>
    tpu.vector_store %arg9[%c0_36, %c0_37, %c0_38], %94 {strides = array<i32>} : memref<1x256x16xf32, #tpu.memory_space<vmem>>, vector<1x256x16xf32>,
    return
  }
  func.func @transform_0(%arg0: i32) -> (i32, i32, i32) {
    %c0_i32 = arith.constant 0 : i32
    %c0_i32_0 = arith.constant 0 : i32
    %c0_i32_1 = arith.constant 0 : i32
    return %arg0, %c0_i32, %c0_i32_0 : i32, i32, i32
  }
  func.func @transform_1(%arg0: i32) -> (i32, i32) {
    %c0_i32 = arith.constant 0 : i32
    %c0_i32_0 = arith.constant 0 : i32
    %c0_i32_1 = arith.constant 0 : i32
    return %c0_i32, %c0_i32_0 : i32, i32
  }
  func.func @transform_2(%arg0: i32) -> (i32, i32) {
    %c0_i32 = arith.constant 0 : i32
    %c0_i32_0 = arith.constant 0 : i32
    %c0_i32_1 = arith.constant 0 : i32
    return %c0_i32, %c0_i32_0 : i32, i32
  }
  func.func @transform_3(%arg0: i32) -> (i32, i32) {
    %c0_i32 = arith.constant 0 : i32
    %c0_i32_0 = arith.constant 0 : i32
    %c0_i32_1 = arith.constant 0 : i32
    return %c0_i32, %c0_i32_0 : i32, i32
  }
  func.func @transform_4(%arg0: i32) -> (i32, i32, i32) {
    %c0_i32 = arith.constant 0 : i32
    %c0_i32_0 = arith.constant 0 : i32
    %c0_i32_1 = arith.constant 0 : i32
    %c0_i32_2 = arith.constant 0 : i32
    return %c0_i32, %c0_i32_0, %c0_i32_1 : i32, i32, i32
  }
  func.func @transform_5(%arg0: i32) -> (i32, i32) {
    %c0_i32 = arith.constant 0 : i32
    %c0_i32_0 = arith.constant 0 : i32
    %c0_i32_1 = arith.constant 0 : i32
    return %c0_i32, %c0_i32_0 : i32, i32
  }
  func.func @transform_6(%arg0: i32) -> (i32, i32) {
    %c0_i32 = arith.constant 0 : i32
    %c0_i32_0 = arith.constant 0 : i32
    %c0_i32_1 = arith.constant 0 : i32
    return %c0_i32, %c0_i32_0 : i32, i32
  }
  func.func @transform_7(%arg0: i32) -> (i32, i32) {
    %c0_i32 = arith.constant 0 : i32
    %c0_i32_0 = arith.constant 0 : i32
    %c0_i32_1 = arith.constant 0 : i32
    return %c0_i32, %c0_i32_0 : i32, i32
  }
  func.func @transform_8(%arg0: i32) -> (i32, i32, i32) {
    %c0_i32 = arith.constant 0 : i32
    %c0_i32_0 = arith.constant 0 : i32
    %c0_i32_1 = arith.constant 0 : i32
    return %arg0, %c0_i32, %c0_i32_0 : i32, i32, i32
  }
}

</mosaic_0001>

<bundles_post_ra>
// kernel: tpu_custom_call.1
= control target key start
LH: loop header
LB: loop body
LE: loop exit
PB: predicated region body
PF: predicated region fallthrough
CT: control target
= control target key end

     0   :  { %s2924_s27 = smov 0   ;;  %s4323_s0 = inlined_call_operand.vmem [shape: bf16[2,256,8], index: 0, kind: input, shape index: {}]   ;;  %s4324_s1 = inlined_call_operand.vmem [shape: bf16[8,4], index: 1, kind: input, shape index: {}]   ;;  %s4325_s2 = inlined_call_operand.vmem [shape: f32[1,4], index: 2, kind: input, shape index: {}]   ;;  %s4326_s3 = inlined_call_operand.vmem [shape: f32[9,4], index: 3, kind: input, shape index: {}]   ;;  %s4327_s4 = inlined_call_operand.vmem [shape: f32[1,1,4], index: 4, kind: input, shape index: {}]   ;;  %s4328_s5 = inlined_call_operand.vmem [shape: bf16[4,16], index: 5, kind: input, shape index: {}]   ;;  %s4329_s6 = inlined_call_operand.vmem [shape: bf16[8,16], index: 6, kind: input, shape index: {}]   ;;  %s4330_s7 = inlined_call_operand.vmem [shape: f32[1,16], index: 7, kind: input, shape index: {}]   ;;  %s4331_s8 = inlined_call_operand.vmem [shape: f32[2,256,16], index: 8, kind: output, shape index: {}]  }
   0x1 LB: > { %s2570_s28 = sadd.s32 4294967295, %s2876_s27   ;;  %p2574_p0 = scmp.ge.s32.totalorder %s2876_s27, 1  ;;  %s2876_s27 = sphi %s2924_s27, %s18_s27  }
   0x2   : > { %p262_p1 = scmp.lt.s32.totalorder %s2876_s27, 3 }
   0x4   : > { %p263_p2 = pnand %p2574_p0, %p262_p1 }
   0x5   : > { %p296_p3 = scmp.lt.s32.totalorder (!%p263_p2), %s2570_s28, 1  ;;  %p2579_p4 = scmp.ne.s32.totalorder (!%p263_p2), %s2570_s28, 0 }
   0x6   : > { %266 = sbr.rel (%p263_p2) target bundleno = 704 (0x2c0), region = 52 }
   0xd   : > { %s297_s29 = scalar_select %p296_p3, %s2570_s28, 1 }
   0xe   : > { %310 = sbr.rel (%p2579_p4) target bundleno = 42 (0x2a), region = 56  ;;  %vm311_vm0 = vcmask (!%p2579_p4), 31744   ;;  %v2878_v0 = vmov (!%p2579_p4), 0.0  }
   0xf   : > { %s2650_s30 = sshll.u32 %s297_s29, 7  ;;  %s2651_s9 = sshll.u32 %s297_s29, 8  ;;  %312 = vst.msk [vmem:[#allocation2] sm:$0xff] (!%p2579_p4), %vm311_vm0, %v2878_v0  ;;  %313 = vst.msk [vmem:[#allocation2 + $0x8] sm:$0xff] (!%p2579_p4), %vm311_vm0, %v2878_v0 }
  0x10   : > { %s2935_s12 = scalar_lea.vmem %s4323_s0, %s2650_s30  ;;  %s2940_s15 = scalar_lea.vmem %s4331_s8, %s2651_s9  ;;  %314 = vst.msk [vmem:[#allocation2 + $0x10] sm:$0xff] (!%p2579_p4), %vm311_vm0, %v2878_v0  ;;  %315 = vst.msk [vmem:[#allocation2 + $0x18] sm:$0xff] (!%p2579_p4), %vm311_vm0, %v2878_v0 }
  0x11   : > { %316 = vst.msk [vmem:[#allocation2 + $0x20] sm:$0xff] (!%p2579_p4), %vm311_vm0, %v2878_v0  ;;  %317 = vst.msk [vmem:[#allocation2 + $0x28] sm:$0xff] (!%p2579_p4), %vm311_vm0, %v2878_v0 }
  0x12   : > { %318 = vst.msk [vmem:[#allocation2 + $0x30] sm:$0xff] (!%p2579_p4), %vm311_vm0, %v2878_v0  ;;  %319 = vst.msk [vmem:[#allocation2 + $0x38] sm:$0xff] (!%p2579_p4), %vm311_vm0, %v2878_v0 }
  0x13   : > { %320 = vst.msk [vmem:[#allocation2 + $0x40] sm:$0xff] (!%p2579_p4), %vm311_vm0, %v2878_v0  ;;  %321 = vst.msk [vmem:[#allocation2 + $0x48] sm:$0xff] (!%p2579_p4), %vm311_vm0, %v2878_v0 }
  0x14   : > { %322 = vst.msk [vmem:[#allocation2 + $0x50] sm:$0xff] (!%p2579_p4), %vm311_vm0, %v2878_v0  ;;  %323 = vst.msk [vmem:[#allocation2 + $0x58] sm:$0xff] (!%p2579_p4), %vm311_vm0, %v2878_v0 }
  0x15   : > { %324 = vst.msk [vmem:[#allocation2 + $0x60] sm:$0xff] %vm311_vm0, %v2878_v0  ;;  %325 = vst.msk [vmem:[#allocation2 + $0x68] sm:$0xff] %vm311_vm0, %v2878_v0 }
  0x16   : > { %326 = vst.msk [vmem:[#allocation2 + $0x70] sm:$0xff] %vm311_vm0, %v2878_v0  ;;  %327 = vst.msk [vmem:[#allocation2 + $0x78] sm:$0xff] %vm311_vm0, %v2878_v0 }
  0x17   : > { %328 = vst.msk [vmem:[#allocation2 + $0x80] sm:$0xff] %vm311_vm0, %v2878_v0  ;;  %329 = vst.msk [vmem:[#allocation2 + $0x88] sm:$0xff] %vm311_vm0, %v2878_v0 }
  0x18   : > { %330 = vst.msk [vmem:[#allocation2 + $0x90] sm:$0xff] %vm311_vm0, %v2878_v0  ;;  %331 = vst.msk [vmem:[#allocation2 + $0x98] sm:$0xff] %vm311_vm0, %v2878_v0 }
  0x19   : > { %332 = vst.msk [vmem:[#allocation2 + $0xa0] sm:$0xff] %vm311_vm0, %v2878_v0  ;;  %333 = vst.msk [vmem:[#allocation2 + $0xa8] sm:$0xff] %vm311_vm0, %v2878_v0 }
  0x1a   : > { %334 = vst.msk [vmem:[#allocation2 + $0xb0] sm:$0xff] %vm311_vm0, %v2878_v0  ;;  %335 = vst.msk [vmem:[#allocation2 + $0xb8] sm:$0xff] %vm311_vm0, %v2878_v0 }
  0x1b   : > { %336 = vst.msk [vmem:[#allocation2 + $0xc0] sm:$0xff] %vm311_vm0, %v2878_v0  ;;  %337 = vst.msk [vmem:[#allocation2 + $0xc8] sm:$0xff] %vm311_vm0, %v2878_v0 }
  0x1c   : > { %338 = vst.msk [vmem:[#allocation2 + $0xd0] sm:$0xff] %vm311_vm0, %v2878_v0  ;;  %339 = vst.msk [vmem:[#allocation2 + $0xd8] sm:$0xff] %vm311_vm0, %v2878_v0 }
  0x1d   : > { %340 = vst.msk [vmem:[#allocation2 + $0xe0] sm:$0xff] %vm311_vm0, %v2878_v0  ;;  %341 = vst.msk [vmem:[#allocation2 + $0xe8] sm:$0xff] %vm311_vm0, %v2878_v0 }
  0x1e   : > { %342 = vst.msk [vmem:[#allocation2 + $0xf0] sm:$0xff] %vm311_vm0, %v2878_v0  ;;  %343 = vst.msk [vmem:[#allocation2 + $0xf8] sm:$0xff] %vm311_vm0, %v2878_v0 }
  0x1f   : > { %344 = vst.msk [vmem:[#allocation2 + $0x100] sm:$0xff] %vm311_vm0, %v2878_v0  ;;  %345 = vst.msk [vmem:[#allocation2 + $0x108] sm:$0xff] %vm311_vm0, %v2878_v0 }
  0x20   : > { %346 = vst.msk [vmem:[#allocation2 + $0x110] sm:$0xff] %vm311_vm0, %v2878_v0  ;;  %347 = vst.msk [vmem:[#allocation2 + $0x118] sm:$0xff] %vm311_vm0, %v2878_v0 }
  0x21   : > { %348 = vst.msk [vmem:[#allocation2 + $0x120] sm:$0xff] %vm311_vm0, %v2878_v0  ;;  %349 = vst.msk [vmem:[#allocation2 + $0x128] sm:$0xff] %vm311_vm0, %v2878_v0 }
  0x22   : > { %350 = vst.msk [vmem:[#allocation2 + $0x130] sm:$0xff] %vm311_vm0, %v2878_v0  ;;  %351 = vst.msk [vmem:[#allocation2 + $0x138] sm:$0xff] %vm311_vm0, %v2878_v0 }
  0x23   : > { %352 = vst.msk [vmem:[#allocation2 + $0x140] sm:$0xff] %vm311_vm0, %v2878_v0  ;;  %353 = vst.msk [vmem:[#allocation2 + $0x148] sm:$0xff] %vm311_vm0, %v2878_v0 }
  0x24   : > { %354 = vst.msk [vmem:[#allocation2 + $0x150] sm:$0xff] %vm311_vm0, %v2878_v0  ;;  %355 = vst.msk [vmem:[#allocation2 + $0x158] sm:$0xff] %vm311_vm0, %v2878_v0 }
  0x25   : > { %356 = vst.msk [vmem:[#allocation2 + $0x160] sm:$0xff] %vm311_vm0, %v2878_v0  ;;  %357 = vst.msk [vmem:[#allocation2 + $0x168] sm:$0xff] %vm311_vm0, %v2878_v0 }
  0x26   : > { %358 = vst.msk [vmem:[#allocation2 + $0x170] sm:$0xff] %vm311_vm0, %v2878_v0  ;;  %359 = vst.msk [vmem:[#allocation2 + $0x178] sm:$0xff] %vm311_vm0, %v2878_v0 }
  0x27   : > { %360 = vst.msk [vmem:[#allocation2 + $0x180] sm:$0xff] %vm311_vm0, %v2878_v0  ;;  %361 = vst.msk [vmem:[#allocation2 + $0x188] sm:$0xff] %vm311_vm0, %v2878_v0 }
  0x28   : > { %362 = vst.msk [vmem:[#allocation2 + $0x190] sm:$0xff] %vm311_vm0, %v2878_v0  ;;  %363 = vst.msk [vmem:[#allocation2 + $0x198] sm:$0xff] %vm311_vm0, %v2878_v0 }
  0x29   : > { %364 = vst.msk [vmem:[#allocation2 + $0x1a0] sm:$0xff] %vm311_vm0, %v2878_v0  ;;  %365 = vst.msk [vmem:[#allocation2 + $0x1a8] sm:$0xff] %vm311_vm0, %v2878_v0 }
  0x2a PF: > { %v398_v1 = vld [vmem:[%s4324_s1] sm:$0xf]  ;;  %vm535_vm1 = vcmask 1043456   ;;  %vm486_vm2 = vcmask 64512   ;;  %v2853_v4 = vld [vmem:[%s2935_s12 + $0x8] sm:$0xff]   ;;  %v2854_v5 = vld [vmem:[%s2935_s12 + $0x10] sm:$0xff]   ;;  %v864_v23 = vlaneseq }
  0x2b   : > { %v2852_v2 = vld [vmem:[%s2935_s12] sm:$0xff]   ;;  %2839 = vmatprep.subr.msk.bf16.mxu0 %vm535_vm1, %v398_v1  ;;  %v537_v3 = vsel %vm535_vm1, %v398_v1, 0  ;;  %v2855_v6 = vld [vmem:[%s2935_s12 + $0x18] sm:$0xff]   ;;  %v2857_v9 = vld [vmem:[%s2935_s12 + $0x28] sm:$0xff]   ;;  %vm2278_vm3 = vcmask 1041408   ;;  %vm733_vm6 = vcmask 31744  }
  0x2c   : > { %2704 = vmatpush3.bf16.msra.mxu0 %v537_v3  ;;  %2705 = vmatprep.mubr.msk.bf16.mxu0 %vm486_vm2, %v2852_v2  ;;  %v2860_v7 = vld [vmem:[%s2935_s12 + $0x40] sm:$0xff]   ;;  %v2858_v10 = vld [vmem:[%s2935_s12 + $0x30] sm:$0xff]   ;;  %v2859_v11 = vld [vmem:[%s2935_s12 + $0x38] sm:$0xff]   ;;  %v3058_v24 = vshrl.u32 %v864_v23, 7  ;;  %vm2482_vm7 = vcmask 130048  }
  0x2d   : > { %v2856_v8 = vld [vmem:[%s2935_s12 + $0x20] sm:$0xff]   ;;  %2755 = vmatprep.mubr.msk.bf16.mxu1 %vm486_vm2, %v2860_v7  ;;  %v2861_v12 = vld [vmem:[%s2935_s12 + $0x48] sm:$0xff]   ;;  %v2862_v13 = vld [vmem:[%s2935_s12 + $0x50] sm:$0xff]  }
  0x2e   : > { %v2863_v14 = vld [vmem:[%s2935_s12 + $0x58] sm:$0xff]   ;;  %v2864_v15 = vld [vmem:[%s2935_s12 + $0x60] sm:$0xff]   ;;  %v2865_v16 = vld [vmem:[%s2935_s12 + $0x68] sm:$0xff]   ;;  %v937_v28 = vsub.s32 1, %v3058_v24  ;;  %v901_v29 = vsub.s32 0, %v3058_v24  ;;  %vm866_vm4 = vcmp.lt.s32.totalorder %v3058_v24, 1 }
  0x2f   : > { %2706 = vmatmul.mubr.msk.bf16.vlgmr.msra.gmra.mrb[0].mxu0 %vm486_vm2, %v2853_v4  ;;  %v2866_v17 = vld [vmem:[%s2935_s12 + $0x70] sm:$0xff]   ;;  %v2867_v18 = vld [vmem:[%s2935_s12 + $0x78] sm:$0xff]   ;;  %v2065_v19 = vld [vmem:[%s4329_s6] sm:$0xf]  ;;  %v1086_v36 = vsub.s32 2, %v3058_v24  ;;  %vm1051_vm5 = vcmp.lt.s32.totalorder %v3058_v24, 7 }
  0x30   : > { %2709 = vmatprep.mubr.msk.bf16.mxu0 %vm486_vm2, %v2854_v5  ;;  %2841 = vmatprep.subr.msk.bf16.mxu1 %vm535_vm1, %v2065_v19  ;;  %v2067_v20 = vsel %vm535_vm1, %v2065_v19, 0  ;;  %v2064_v21 = vld [vmem:[%s4328_s5] sm:$0x3]  ;;  %v770_v26 = vld [vmem:[#allocation2 + $0x10] sm:$0xff]  ;;  %v769_v27 = vld [vmem:[#allocation2 + $0x8] sm:$0xff]  ;;  %v1350_v54 = vsub.s32 4, %v3058_v24 }
  0x31   : > { %2840 = vmatprep.subr.msk.bf16.mxu0 %vm535_vm1, %v2065_v19  ;;  %2806 = vmatpush3.bf16.msra.mxu1 %v2067_v20  ;;  %v2280_v22 = vsel %vm2278_vm3, %v2064_v21, 0  ;;  %v768_v25 = vld [vmem:[#allocation2] sm:$0xff]  ;;  %v848_v32 = vrot.slane %v770_v26, 7  ;;  %v832_v33 = vrot.slane %v769_v27, 7  ;;  %v1019_v39 = vrot.slane %v769_v27, 1  ;;  %v3097_v53 = vld [vmem:[#allocation2 + $0x28] sm:$0xff] }
  0x32   : > { %2738 = vmatpush3.bf16.msra.mxu0 %v2067_v20  ;;  %2842 = vmatprep.subr.msk.bf16.mxu1 %vm2278_vm3, %v2064_v21  ;;  %v3065_v30 = vld [vmem:[%s4326_s3] sm:$0xff]  ;;  %v816_v31 = vrot.slane %v768_v25, 7  ;;  %v1003_v38 = vrot.slane %v768_v25, 1  ;;  %v1035_v41 = vrot.slane %v770_v26, 1  ;;  %v1282_v58 = vsub.s32 3, %v3058_v24 }
  0x33   : > { %v3069_v34 = vrot.slane %v3065_v30, %v937_v28  ;;  %v3072_v35 = vrot.slane %v3065_v30, %v901_v29  ;;  %v3083_v44 = vrot.slane %v3065_v30, %v1086_v36  ;;  %v3092_v48 = vld [vmem:[%s4325_s2] ss:$0 sm:$0xff]  ;;  %v1498_v62 = vsub.s32 5, %v3058_v24  ;;  %v3149_v28 = vld [vmem:[#allocation2 + $0xd0] sm:$0xff]  ;;  %v3156_v36 = vld [vmem:[#allocation2 + $0xe8] sm:$0xff] }
  0x34   : > { %2756 = vmatmul.mubr.msk.bf16.vlgmr.msra.gmra.mrb[0].mxu1 %vm486_vm2, %v2861_v12  ;;  %v883_v37 = vsel %vm866_vm4, %v848_v32, %v816_v31  ;;  %v867_v40 = vsel %vm866_vm4, %v816_v31, %v832_v33  ;;  %v1068_v47 = vsel %vm1051_vm5, %v1003_v38, %v1019_v39  ;;  %v1052_v49 = vsel %vm1051_vm5, %v1019_v39, %v1035_v41  ;;  %v3105_v63 = vld [vmem:[#allocation2 + $0x40] sm:$0xff] }
  0x35   : > { %2759 = vmatprep.mubr.msk.bf16.mxu1 %vm486_vm2, %v2862_v13  ;;  %2772 = vmatpush3.bf16.msra.mxu1 %v2280_v22  ;;  %v903_v42 = vmul.f32 %v3072_v35, %v883_v37  ;;  %v939_v43 = vmul.f32 %v3069_v34, %v768_v25  ;;  %v904_v45 = vmul.f32 %v3072_v35, %v867_v40  ;;  %v1695_v0 = vsub.s32 6, %v3058_v24  ;;  %v3138_v21 = vld [vmem:[#allocation2 + $0xa0] sm:$0xff]  ;;  %v3140_v22 = vld [vmem:[#allocation2 + $0xb8] sm:$0xff] }
  0x36   : > { %v940_v46 = vmul.f32 %v3069_v34, %v769_v27  ;;  %v1088_v52 = vmul.f32 %v3083_v44, %v1068_v47  ;;  %v1089_v61 = vmul.f32 %v3083_v44, %v1052_v49  ;;  %v3133_v19 = vrot.slane %v3065_v30, %v1498_v62 }
  0x37   : > { %2710 = vmatmul.mubr.msk.bf16.gmra.mrb[4].mxu0 %vm486_vm2, %v2855_v6  ;;  %v971_v51 = vadd.f32 %v939_v43, %v903_v42  ;;  %v3136_v20 = vrot.slane %v3065_v30, %v1695_v0  ;;  %v1861_v25 = vrot.slane %v3105_v63, 1  ;;  %v1649_v39 = vrot.slane %v3138_v21, 7  ;;  %v3162_v42 = vld [vmem:[#allocation2 + $0x100] sm:$0xff] }
  0x38   : > { %2713 = vmatprep.mubr.msk.bf16.mxu0 %vm486_vm2, %v2856_v8  ;;  %v972_v57 = vadd.f32 %v940_v46, %v904_v45  ;;  %v1865_v40 = vrot.slane %v3138_v21, 1  ;;  %v1650_v41 = vrot.slane %v3140_v22, 7  ;;  %v1866_v46 = vrot.slane %v3140_v22, 1 }
  0x3c   : > { %2760 = vmatmul.mubr.msk.bf16.gmra.mrb[4].mxu1 %vm486_vm2, %v2863_v14 }
  0x3d   : > { %2763 = vmatprep.mubr.msk.bf16.mxu1 %vm486_vm2, %v2864_v15 }
  0x3f   : > { %2714 = vmatmul.mubr.msk.bf16.gmra.mrb[8].mxu0 %vm486_vm2, %v2857_v9 }
  0x40   : > { %2717 = vmatprep.mubr.msk.bf16.mxu0 %vm486_vm2, %v2858_v10 }
  0x44   : > { %2764 = vmatmul.mubr.msk.bf16.gmra.mrb[8].mxu1 %vm486_vm2, %v2865_v16 }
  0x45   : > { %2767 = vmatprep.mubr.msk.bf16.mxu1 %vm486_vm2, %v2866_v17 }
  0x47   : > { %2718 = vmatmul.mubr.msk.bf16.gmra.mrb[12].mxu0 %vm486_vm2, %v2859_v11 }
  0x48   : > { %2721 = vmatprep.mubr.msk.bf16.mxu0 %vm486_vm2, %v2860_v7 }
  0x4c   : > { %2768 = vmatmul.mubr.msk.bf16.gmra.mrb[12].mxu1 %vm486_vm2, %v2867_v18 }
  0x4f   : > { %2722 = vmatmul.mubr.msk.bf16.gmra.mrb[16].mxu0 %vm486_vm2, %v2861_v12  ;;  %v3121_v12 = vrot.slane %v3065_v30, %v1282_v58 }
  0x50   : > { %2725 = vmatprep.mubr.msk.bf16.mxu0 %vm486_vm2, %v2862_v13  ;;  %v1448_v13 = vrot.slane %v3097_v53, 1 }
  0x57   : > { %2726 = vmatmul.mubr.msk.bf16.gmra.mrb[20].mxu0 %vm486_vm2, %v2863_v14  ;;  %v1645_v14 = vrot.slane %v3105_v63, 7 }
  0x58   : > { %2729 = vmatprep.mubr.msk.bf16.mxu0 %vm486_vm2, %v2864_v15  ;;  %v3125_v15 = vld [vmem:[#allocation2 + $0x70] sm:$0xff] }
  0x59   : > { %v1647_v31 = vrot.slane %v3125_v15, 7  ;;  %v1863_v32 = vrot.slane %v3125_v15, 1 }
  0x5f   : > { %2730 = vmatmul.mubr.msk.bf16.gmra.mrb[24].mxu0 %vm486_vm2, %v2865_v16  ;;  %v3127_v16 = vld [vmem:[#allocation2 + $0x88] sm:$0xff] }
  0x60   : > { %2733 = vmatprep.mubr.msk.bf16.mxu0 %vm486_vm2, %v2866_v17  ;;  %v1648_v33 = vrot.slane %v3127_v16, 7 }
  0x67   : > { %2734 = vmatmul.mubr.msk.bf16.gmra.mrb[28].mxu0 %vm486_vm2, %v2867_v18  ;;  %v3130_v18 = vadd.f32 %v1089_v61, %v972_v57 }
  0x68   : > { %2739 = vmatprep.mubr.msk.bf16.mxu0 %vm486_vm2, %v2852_v2 }
  0x6f   : > { %2740 = vmatmul.mubr.msk.bf16.vlgmr.msra.gmra.mrb[32].mxu0 %vm486_vm2, %v2853_v4  ;;  %v1232_v4 = vrot.slane %v3097_v53, 7 }
  0x70   : > { %2743 = vmatprep.mubr.msk.bf16.mxu0 %vm486_vm2, %v2854_v5  ;;  %v1763_v5 = vsub.s32 7, %v3058_v24 }
  0x72   : > { %v3144_v23 = vrot.slane %v3065_v30, %v1763_v5 }
  0x77   : > { %2744 = vmatmul.mubr.msk.bf16.gmra.mrb[36].mxu0 %vm486_vm2, %v2855_v6 }
  0x78   : > { %2747 = vmatprep.mubr.msk.bf16.mxu0 %vm486_vm2, %v2856_v8  ;;  %v3112_v8 = vadd.f32 %v1088_v52, %v971_v51 }
  0x7f   : > { %2748 = vmatmul.mubr.msk.bf16.gmra.mrb[40].mxu0 %vm486_vm2, %v2857_v9  ;;  %v3115_v9 = vrot.slane %v3065_v30, %v1350_v54  ;;  %v1864_v30 = vrot.slane %v3127_v16, 1 }
  0x80   : > { %2751 = vmatprep.mubr.msk.bf16.mxu0 %vm486_vm2, %v2858_v10  ;;  %v3117_v10 = vld [vmem:[#allocation2 + $0x58] sm:$0xff] }
  0x81   : > { %v1646_v26 = vrot.slane %v3117_v10, 7  ;;  %v1862_v27 = vrot.slane %v3117_v10, 1 }
  0x87   : > { %2752 = vmatmul.mubr.msk.bf16.gmra.mrb[44].mxu0 %vm486_vm2, %v2859_v11 }
 0x102   : > { %v2707_v50 = vpop.f32.mrb[0].mxu0 }
 0x103   : > { %v582_v55 = vadd.f32 %v2707_v50, %v3092_v48  ;;  %v573_v56 = vpop.f32.mrb[1].mxu0 }
 0x104   : > { %v574_v59 = vadd.f32 %v3092_v48, %v573_v56  ;;  %v2708_v60 = vpop.f32.mrb[2].mxu0 }
 0x105   : > { %v702_v1 = vmax.f32 %v582_v55, 0.0  ;;  %v585_v2 = vadd.f32 %v2708_v60, %v3092_v48  ;;  %v576_v3 = vpop.f32.mrb[3].mxu0 }
 0x106   : > { %v700_v6 = vmax.f32 %v574_v59, 0.0  ;;  %v577_v7 = vadd.f32 %v3092_v48, %v576_v3 }
 0x107   : > { %736 = vst.msk [vmem:[#allocation2 + $0x30] sm:$0xff] %vm733_vm6, %v702_v1  ;;  %v703_v11 = vmax.f32 %v585_v2, 0.0 }
 0x108   : > { %734 = vst.msk [vmem:[#allocation2 + $0x18] sm:$0xff] %vm733_vm6, %v700_v6  ;;  %v701_v17 = vmax.f32 %v577_v7, 0.0 }
 0x109   : > { %737 = vst.msk [vmem:[#allocation2 + $0x38] sm:$0xff] %vm733_vm6, %v703_v11 }
 0x10a   : > { %735 = vst.msk [vmem:[#allocation2 + $0x20] sm:$0xff] %vm733_vm6, %v701_v17  ;;  %v2711_v29 = vpop.f32.mrb[4].mxu0 }
 0x10b   : > { %v598_v37 = vadd.f32 %v2711_v29, %v3092_v48  ;;  %v589_v38 = vpop.f32.mrb[5].mxu0 }
 0x10c   : > { %v590_v43 = vadd.f32 %v3092_v48, %v589_v38  ;;  %v2712_v45 = vpop.f32.mrb[6].mxu0 }
 0x10d   : > { %v706_v50 = vmax.f32 %v598_v37, 0.0  ;;  %v601_v51 = vadd.f32 %v2712_v45, %v3092_v48  ;;  %v592_v52 = vpop.f32.mrb[7].mxu0 }
 0x10e   : > { %v704_v56 = vmax.f32 %v590_v43, 0.0  ;;  %v593_v57 = vadd.f32 %v3092_v48, %v592_v52  ;;  %v3172_v58 = vld [vmem:[#allocation2 + $0x30] sm:$0xff] }
 0x10f   : > { %v771_v61 = vld [vmem:[#allocation2 + $0x18] sm:$0xff]  ;;  %740 = vst.msk [vmem:[#allocation2 + $0x60] sm:$0xff] %vm733_vm6, %v706_v50  ;;  %v707_v62 = vmax.f32 %v601_v51, 0.0  ;;  %v1613_v0 = vrot.slane %v3172_v58, 7  ;;  %v3180_v1 = vmul.f32 %v3144_v23, %v3172_v58  ;;  %v1829_v2 = vrot.slane %v3172_v58, 1 }
 0x110   : > { %v817_v3 = vrot.slane %v771_v61, 7  ;;  %v3184_v5 = vmul.f32 %v3069_v34, %v771_v61  ;;  %v1004_v6 = vrot.slane %v771_v61, 1  ;;  %738 = vst.msk [vmem:[#allocation2 + $0x48] sm:$0xff] %vm733_vm6, %v704_v56  ;;  %v705_v7 = vmax.f32 %v593_v57, 0.0  ;;  %v3187_v11 = vld [vmem:[#allocation2 + $0x38] sm:$0xff] }
 0x111   : > { %v772_v17 = vld [vmem:[#allocation2 + $0x20] sm:$0xff]  ;;  %741 = vst.msk [vmem:[#allocation2 + $0x68] sm:$0xff] %vm733_vm6, %v707_v62  ;;  %v1352_v29 = vmul.f32 %v3115_v9, %v771_v61  ;;  %v1629_v37 = vrot.slane %v3187_v11, 7  ;;  %v3194_v38 = vsel %vm866_vm4, %v1645_v14, %v1613_v0  ;;  %v3198_v43 = vmul.f32 %v3144_v23, %v3187_v11 }
 0x112   : > { %v833_v45 = vrot.slane %v772_v17, 7  ;;  %v942_v50 = vmul.f32 %v3069_v34, %v772_v17  ;;  %v1020_v51 = vrot.slane %v772_v17, 1  ;;  %739 = vst.msk [vmem:[#allocation2 + $0x50] sm:$0xff] %vm733_vm6, %v705_v7  ;;  %v2715_v52 = vpop.f32.mrb[8].mxu0  ;;  %v1264_v56 = vsel %vm866_vm4, %v1232_v4, %v817_v3 }
 0x113   : > { %v614_v57 = vadd.f32 %v2715_v52, %v3092_v48  ;;  %v605_v14 = vpop.f32.mrb[9].mxu0  ;;  %v1284_v61 = vmul.f32 %v3121_v12, %v1264_v56  ;;  %v1353_v62 = vmul.f32 %v3115_v9, %v772_v17  ;;  %v3211_v60 = vsel %vm866_vm4, %v1613_v0, %v1629_v37 }
 0x114   : > { %v606_v59 = vadd.f32 %v3092_v48, %v605_v14  ;;  %v2716_v7 = vpop.f32.mrb[10].mxu0  ;;  %v1248_v55 = vsel %vm866_vm4, %v817_v3, %v833_v45  ;;  %v1464_v4 = vsel %vm1051_vm5, %v1020_v51, %v1448_v13  ;;  %v1480_v52 = vsel %vm1051_vm5, %v1004_v6, %v1020_v51 }
 0x115   : > { %v710_v54 = vmax.f32 %v614_v57, 0.0  ;;  %v617_v17 = vadd.f32 %v2716_v7, %v3092_v48  ;;  %v608_v49 = vpop.f32.mrb[11].mxu0  ;;  %v1285_v0 = vmul.f32 %v3121_v12, %v1248_v55  ;;  %v1316_v37 = vadd.f32 %v1284_v61, %v3112_v8  ;;  %v3236_v8 = vld [vmem:[%s4326_s3 + $0x8] ss:$0 sm:$0xff] }
 0x116   : > { %v708_v14 = vmax.f32 %v606_v59, 0.0  ;;  %v609_v47 = vadd.f32 %v3092_v48, %v608_v49  ;;  %v1500_v3 = vmul.f32 %v3133_v19, %v1480_v52  ;;  %v1501_v53 = vmul.f32 %v3133_v19, %v1464_v4 }
 0x117   : > { %744 = vst.msk [vmem:[#allocation2 + $0x90] sm:$0xff] %vm733_vm6, %v710_v54  ;;  %v711_v13 = vmax.f32 %v617_v17, 0.0  ;;  %v1317_v6 = vadd.f32 %v1285_v0, %v3130_v18  ;;  %v1384_v45 = vadd.f32 %v1352_v29, %v1316_v37  ;;  %v1697_v51 = vmul.f32 %v3136_v20, %v3194_v38 }
 0x118   : > { %742 = vst.msk [vmem:[#allocation2 + $0x78] sm:$0xff] %vm733_vm6, %v708_v14  ;;  %v709_v57 = vmax.f32 %v609_v47, 0.0  ;;  %v1698_v49 = vmul.f32 %v3136_v20, %v3211_v60  ;;  %v1845_v54 = vrot.slane %v3187_v11, 1  ;;  %v905_v29 = vmul.f32 %v1264_v56, %v3072_v35 }
 0x119   : > { %745 = vst.msk [vmem:[#allocation2 + $0x98] sm:$0xff] %vm733_vm6, %v711_v13  ;;  %v1385_v18 = vadd.f32 %v1353_v62, %v1317_v6  ;;  %v1532_v59 = vadd.f32 %v1500_v3, %v1384_v45  ;;  %v906_v61 = vmul.f32 %v1248_v55, %v3072_v35  ;;  %v1091_v62 = vmul.f32 %v1464_v4, %v3083_v44 }
 0x11a   : > { %743 = vst.msk [vmem:[#allocation2 + $0x80] sm:$0xff] %vm733_vm6, %v709_v57  ;;  %v2719_v47 = vpop.f32.mrb[12].mxu0  ;;  %v3249_v7 = vsel %vm1051_vm5, %v1845_v54, %v1861_v25  ;;  %v3253_v17 = vsel %vm1051_vm5, %v1829_v2, %v1845_v54  ;;  %v973_v13 = vadd.f32 %v3184_v5, %v905_v29 }
 0x11b   : > { %v630_v0 = vadd.f32 %v2719_v47, %v3092_v48  ;;  %v621_v56 = vpop.f32.mrb[13].mxu0  ;;  %v1533_v37 = vadd.f32 %v1501_v53, %v1385_v18  ;;  %v1729_v55 = vadd.f32 %v1697_v51, %v1532_v59  ;;  %v1913_v14 = vmul.f32 %v3236_v8, %v3253_v17  ;;  %v3269_v18 = vld [vmem:[%s4327_s4] ss:$0 sm:$0xff] }
 0x11c   : > { %v622_v63 = vadd.f32 %v3092_v48, %v621_v56  ;;  %v2720_v3 = vpop.f32.mrb[14].mxu0  ;;  %v1914_v25 = vmul.f32 %v3236_v8, %v3249_v7  ;;  %v974_v2 = vadd.f32 %v942_v50, %v906_v61  ;;  %v1090_v59 = vmul.f32 %v1480_v52, %v3083_v44 }
 0x11d   : > { %v714_v6 = vmax.f32 %v630_v0, 0.0  ;;  %v633_v4 = vadd.f32 %v2720_v3, %v3092_v48  ;;  %v624_v45 = vpop.f32.mrb[15].mxu0  ;;  %v1730_v57 = vadd.f32 %v1698_v49, %v1533_v37  ;;  %v1797_v53 = vadd.f32 %v3180_v1, %v1729_v55  ;;  %v3276_v49 = vld [vmem:[#allocation2 + $0x48] sm:$0xff] }
 0x11e   : > { %v712_v51 = vmax.f32 %v622_v63, 0.0  ;;  %v625_v54 = vadd.f32 %v3092_v48, %v624_v45  ;;  %v1123_v47 = vadd.f32 %v1091_v62, %v974_v2  ;;  %v1286_v1 = vmul.f32 %v3194_v38, %v3121_v12  ;;  %v3283_v62 = vld [vmem:[#allocation2 + $0x50] sm:$0xff] }
 0x11f   : > { %748 = vst.msk [vmem:[#allocation2 + $0xc0] sm:$0xff] %vm733_vm6, %v714_v6  ;;  %v715_v5 = vmax.f32 %v633_v4, 0.0  ;;  %v1798_v50 = vadd.f32 %v3198_v43, %v1730_v57  ;;  %v1945_v29 = vadd.f32 %v1913_v14, %v1797_v53  ;;  %v1122_v0 = vadd.f32 %v1090_v59, %v973_v13 }
 0x120   : > { %746 = vst.msk [vmem:[#allocation2 + $0xa8] sm:$0xff] %vm733_vm6, %v712_v51  ;;  %v713_v61 = vmax.f32 %v625_v54, 0.0  ;;  %v1287_v56 = vmul.f32 %v3211_v60, %v3121_v12  ;;  %v1354_v52 = vmul.f32 %v3172_v58, %v3115_v9  ;;  %v1355_v55 = vmul.f32 %v3187_v11, %v3115_v9 }
 0x121   : > { %749 = vst.msk [vmem:[#allocation2 + $0xc8] sm:$0xff] %vm733_vm6, %v715_v5  ;;  %v1946_v43 = vadd.f32 %v1914_v25, %v1798_v50  ;;  %v1984_v37 = vadd.f32 %v3269_v18, %v1945_v29  ;;  %v1502_v14 = vmul.f32 %v3253_v17, %v3133_v19  ;;  %v1318_v3 = vadd.f32 %v1286_v1, %v1122_v0 }
 0x122   : > { %747 = vst.msk [vmem:[#allocation2 + $0xb0] sm:$0xff] %vm733_vm6, %v713_v61  ;;  %v2723_v63 = vpop.f32.mrb[16].mxu0  ;;  %v1319_v13 = vadd.f32 %v1287_v56, %v1123_v47  ;;  %v1503_v2 = vmul.f32 %v3249_v7, %v3133_v19  ;;  %v1614_v6 = vrot.slane %v3276_v49, 7  ;;  %v1630_v53 = vrot.slane %v3283_v62, 7 }
 0x123   : > { %v646_v25 = vadd.f32 %v2723_v63, %v3092_v48  ;;  %v637_v4 = vpop.f32.mrb[17].mxu0  ;;  %v1985_v45 = vadd.f32 %v3269_v18, %v1946_v43  ;;  %v2016_v57 = vmax.f32 %v1984_v37, 0.0  ;;  %v1386_v59 = vadd.f32 %v1354_v52, %v1318_v3 }
 0x124   : > { %v638_v51 = vadd.f32 %v3092_v48, %v637_v4  ;;  %v2724_v54 = vpop.f32.mrb[18].mxu0  ;;  %v1387_v5 = vadd.f32 %v1355_v55, %v1319_v13  ;;  %v3303_v47 = vsel %vm866_vm4, %v1646_v26, %v1614_v6  ;;  %v3308_v0 = vsel %vm866_vm4, %v1614_v6, %v1630_v53 }
 0x125   : > { %v718_v50 = vmax.f32 %v646_v25, 0.0  ;;  %v649_v29 = vadd.f32 %v2724_v54, %v3092_v48  ;;  %v640_v1 = vpop.f32.mrb[19].mxu0  ;;  %v2017_v61 = vmax.f32 %v1985_v45, 0.0  ;;  %v1534_v52 = vadd.f32 %v1502_v14, %v1386_v59 }
 0x126   : > { %v716_v56 = vmax.f32 %v638_v51, 0.0  ;;  %v641_v43 = vadd.f32 %v3092_v48, %v640_v1  ;;  %v1535_v37 = vadd.f32 %v1503_v2, %v1387_v5  ;;  %v1699_v26 = vmul.f32 %v3136_v20, %v3303_v47 }
 0x127   : > { %752 = vst.msk [vmem:[#allocation2 + $0xf0] sm:$0xff] %vm733_vm6, %v718_v50  ;;  %v719_v55 = vmax.f32 %v649_v29, 0.0  ;;  %v2048_v63 = vpack.c.bf16 %v2017_v61, %v2016_v57  ;;  %v1700_v3 = vmul.f32 %v3136_v20, %v3308_v0  ;;  %v1767_v6 = vmul.f32 %v3144_v23, %v3276_v49 }
 0x128   : > { %750 = vst.msk [vmem:[#allocation2 + $0xd8] sm:$0xff] %vm733_vm6, %v716_v56  ;;  %v717_v13 = vmax.f32 %v641_v43, 0.0  ;;  %v1768_v14 = vmul.f32 %v3144_v23, %v3283_v62  ;;  %v1830_v2 = vrot.slane %v3276_v49, 1  ;;  %v1731_v25 = vadd.f32 %v1699_v26, %v1534_v52 }
 0x129   : > { %753 = vst.msk [vmem:[#allocation2 + $0xf8] sm:$0xff] %vm733_vm6, %v719_v55  ;;  %2773 = vmatprep.mubr.msk.bf16.mxu1 %vm733_vm6, %v2048_v63  ;;  %v1732_v4 = vadd.f32 %v1700_v3, %v1535_v37  ;;  %v1846_v45 = vrot.slane %v3283_v62, 1  ;;  %v907_v57 = vmul.f32 %v3194_v38, %v3072_v35  ;;  %v908_v51 = vmul.f32 %v3211_v60, %v3072_v35 }
 0x12a   : > { %751 = vst.msk [vmem:[#allocation2 + $0xe0] sm:$0xff] %vm733_vm6, %v717_v13  ;;  %v2727_v53 = vpop.f32.mrb[20].mxu0  ;;  %v943_v54 = vmul.f32 %v3172_v58, %v3069_v34  ;;  %v944_v59 = vmul.f32 %v3187_v11, %v3069_v34  ;;  %v1092_v5 = vmul.f32 %v3253_v17, %v3083_v44  ;;  %v1799_v1 = vadd.f32 %v1767_v6, %v1731_v25 }
 0x12b   : > { %v662_v50 = vadd.f32 %v2727_v53, %v3092_v48  ;;  %v653_v29 = vpop.f32.mrb[21].mxu0  ;;  %v1800_v38 = vadd.f32 %v1768_v14, %v1732_v4  ;;  %v3341_v61 = vsel %vm1051_vm5, %v1846_v45, %v1862_v27  ;;  %v3346_v11 = vsel %vm1051_vm5, %v1830_v2, %v1846_v45  ;;  %v3363_v53 = vld [vmem:[#allocation2 + $0x60] sm:$0xff] }
 0x12c   : > { %v654_v60 = vadd.f32 %v3092_v48, %v653_v29  ;;  %v2728_v58 = vpop.f32.mrb[22].mxu0  ;;  %v1916_v17 = vmul.f32 %v3236_v8, %v3341_v61  ;;  %v975_v56 = vadd.f32 %v943_v54, %v907_v57  ;;  %v1915_v10 = vmul.f32 %v3236_v8, %v3346_v11 }
 0x12d   : > { %v722_v43 = vmax.f32 %v662_v50, 0.0  ;;  %v665_v52 = vadd.f32 %v2728_v58, %v3092_v48  ;;  %v656_v37 = vpop.f32.mrb[23].mxu0  ;;  %v976_v27 = vadd.f32 %v944_v59, %v908_v51  ;;  %v1093_v3 = vmul.f32 %v3249_v7, %v3083_v44  ;;  %v3365_v7 = vld [vmem:[#allocation2 + $0x68] sm:$0xff] }
 0x12e   : > { %v720_v55 = vmax.f32 %v654_v60, 0.0  ;;  %v657_v63 = vadd.f32 %v3092_v48, %v656_v37  ;;  %v1948_v26 = vadd.f32 %v1916_v17, %v1800_v38  ;;  %v1947_v6 = vadd.f32 %v1915_v10, %v1799_v1 }
 0x12f   : > { %756 = vst.msk [vmem:[#allocation2 + $0x120] sm:$0xff] %vm733_vm6, %v722_v43  ;;  %v723_v13 = vmax.f32 %v665_v52, 0.0  ;;  %v1124_v14 = vadd.f32 %v1092_v5, %v975_v56  ;;  %v1288_v2 = vmul.f32 %v3303_v47, %v3121_v12  ;;  %v1125_v45 = vadd.f32 %v1093_v3, %v976_v27 }
 0x130   : > { %754 = vst.msk [vmem:[#allocation2 + $0x108] sm:$0xff] %vm733_vm6, %v720_v55  ;;  %v721_v25 = vmax.f32 %v657_v63, 0.0  ;;  %v1987_v4 = vadd.f32 %v3269_v18, %v1948_v26  ;;  %v1289_v57 = vmul.f32 %v3308_v0, %v3121_v12  ;;  %v1986_v51 = vadd.f32 %v3269_v18, %v1947_v6 }
 0x131   : > { %757 = vst.msk [vmem:[#allocation2 + $0x128] sm:$0xff] %vm733_vm6, %v723_v13  ;;  %v1320_v54 = vadd.f32 %v1288_v2, %v1124_v14  ;;  %v1356_v59 = vmul.f32 %v3276_v49, %v3115_v9  ;;  %v1357_v5 = vmul.f32 %v3283_v62, %v3115_v9  ;;  %v1504_v1 = vmul.f32 %v3346_v11, %v3133_v19 }
 0x132   : > { %755 = vst.msk [vmem:[#allocation2 + $0x110] sm:$0xff] %vm733_vm6, %v721_v25  ;;  %v2019_v50 = vmax.f32 %v1987_v4, 0.0  ;;  %v1321_v29 = vadd.f32 %v1289_v57, %v1125_v45  ;;  %v1505_v38 = vmul.f32 %v3341_v61, %v3133_v19  ;;  %v2731_v60 = vpop.f32.mrb[24].mxu0  ;;  %v2018_v58 = vmax.f32 %v1986_v51, 0.0 }
 0x133   : > { %v1388_v17 = vadd.f32 %v1356_v59, %v1320_v54  ;;  %v1615_v56 = vrot.slane %v3363_v53, 7  ;;  %v1631_v43 = vrot.slane %v3365_v7, 7  ;;  %v669_v52 = vpop.f32.mrb[25].mxu0  ;;  %v1769_v10 = vmul.f32 %v3144_v23, %v3363_v53 }
 0x134   : > { %v1389_v37 = vadd.f32 %v1357_v5, %v1321_v29  ;;  %v1770_v27 = vmul.f32 %v3144_v23, %v3365_v7  ;;  %v1831_v55 = vrot.slane %v3363_v53, 1  ;;  %v2732_v63 = vpop.f32.mrb[26].mxu0  ;;  %v2049_v26 = vpack.c.bf16 %v2019_v50, %v2018_v58 }
 0x135   : > { %v1536_v3 = vadd.f32 %v1504_v1, %v1388_v17  ;;  %v3387_v13 = vsel %vm866_vm4, %v1615_v56, %v1631_v43  ;;  %v3393_v6 = vsel %vm866_vm4, %v1647_v31, %v1615_v56  ;;  %v672_v14 = vpop.f32.mrb[27].mxu0  ;;  %v1847_v45 = vrot.slane %v3365_v7, 1 }
 0x136   : > { %v1537_v2 = vadd.f32 %v1505_v38, %v1389_v37  ;;  %v1701_v25 = vmul.f32 %v3136_v20, %v3393_v6  ;;  %v1702_v4 = vmul.f32 %v3136_v20, %v3387_v13  ;;  %2774 = vmatmul.mubr.msk.bf16.vlgmr.msra.gmra.mrb[16].mxu1 %vm733_vm6, %v2049_v26  ;;  %v678_v57 = vadd.f32 %v2731_v60, %v3092_v48 }
 0x137   : > { %v670_v51 = vadd.f32 %v3092_v48, %v669_v52  ;;  %v681_v54 = vadd.f32 %v2732_v63, %v3092_v48  ;;  %v673_v31 = vadd.f32 %v3092_v48, %v672_v14  ;;  %v3409_v50 = vsel %vm1051_vm5, %v1847_v45, %v1863_v32 }
 0x138   : > { %v1733_v59 = vadd.f32 %v1701_v25, %v1536_v3  ;;  %v1734_v5 = vadd.f32 %v1702_v4, %v1537_v2  ;;  %v3413_v29 = vsel %vm1051_vm5, %v1831_v55, %v1847_v45  ;;  %v1918_v38 = vmul.f32 %v3236_v8, %v3409_v50  ;;  %v3445_v25 = vld [vmem:[#allocation2 + $0x78] sm:$0xff]  ;;  %v3447_v4 = vld [vmem:[#allocation2 + $0x80] sm:$0xff] }
 0x139   : > { %v1917_v1 = vmul.f32 %v3236_v8, %v3413_v29  ;;  %v726_v60 = vmax.f32 %v678_v57, 0.0  ;;  %v724_v58 = vmax.f32 %v670_v51, 0.0  ;;  %v727_v43 = vmax.f32 %v681_v54, 0.0 }
 0x13a   : > { %v1801_v17 = vadd.f32 %v1769_v10, %v1733_v59  ;;  %v1802_v56 = vadd.f32 %v1770_v27, %v1734_v5  ;;  %v725_v15 = vmax.f32 %v673_v31, 0.0  ;;  %v3419_v52 = vpop.f32.mrb[28].mxu0  ;;  %v909_v32 = vmul.f32 %v3303_v47, %v3072_v35 }
 0x13b   : > { %760 = vst.msk [vmem:[#allocation2 + $0x150] sm:$0xff] %vm733_vm6, %v726_v60  ;;  %758 = vst.msk [vmem:[#allocation2 + $0x138] sm:$0xff] %vm733_vm6, %v724_v58  ;;  %v910_v37 = vmul.f32 %v3308_v0, %v3072_v35  ;;  %v945_v55 = vmul.f32 %v3276_v49, %v3069_v34  ;;  %v946_v10 = vmul.f32 %v3283_v62, %v3069_v34  ;;  %v3431_v27 = vpop.f32.mrb[29].mxu0  ;;  %v1616_v60 = vrot.slane %v3445_v25, 7 }
 0x13c   : > { %v1949_v63 = vadd.f32 %v1917_v1, %v1801_v17  ;;  %v1950_v26 = vadd.f32 %v1918_v38, %v1802_v56  ;;  %761 = vst.msk [vmem:[#allocation2 + $0x158] sm:$0xff] %vm733_vm6, %v727_v43  ;;  %759 = vst.msk [vmem:[#allocation2 + $0x140] sm:$0xff] %vm733_vm6, %v725_v15  ;;  %v1094_v47 = vmul.f32 %v3346_v11, %v3083_v44  ;;  %v3439_v3 = vpop.f32.mrb[30].mxu0  ;;  %v1632_v58 = vrot.slane %v3447_v4, 7 }
 0x13d   : > { %v1095_v0 = vmul.f32 %v3341_v61, %v3083_v44  ;;  %v977_v49 = vadd.f32 %v945_v55, %v909_v32  ;;  %v978_v14 = vadd.f32 %v946_v10, %v910_v37  ;;  %v1290_v62 = vmul.f32 %v3393_v6, %v3121_v12  ;;  %v3449_v45 = vpop.f32.mrb[31].mxu0 }
 0x13e   : > { %v1291_v2 = vmul.f32 %v3387_v13, %v3121_v12  ;;  %v1988_v11 = vadd.f32 %v3269_v18, %v1949_v63  ;;  %v1989_v61 = vadd.f32 %v3269_v18, %v1950_v26  ;;  %v1358_v57 = vmul.f32 %v3363_v53, %v3115_v9 }
 0x13f   : > { %v1359_v51 = vmul.f32 %v3365_v7, %v3115_v9  ;;  %v1126_v54 = vadd.f32 %v1094_v47, %v977_v49  ;;  %v1127_v31 = vadd.f32 %v1095_v0, %v978_v14  ;;  %v1506_v59 = vmul.f32 %v3413_v29, %v3133_v19 }
 0x140   : > { %v1507_v5 = vmul.f32 %v3409_v50, %v3133_v19  ;;  %v2020_v1 = vmax.f32 %v1988_v11, 0.0  ;;  %v2021_v38 = vmax.f32 %v1989_v61, 0.0  ;;  %v1771_v43 = vmul.f32 %v3144_v23, %v3445_v25 }
 0x141   : > { %v1322_v17 = vadd.f32 %v1290_v62, %v1126_v54  ;;  %v1323_v56 = vadd.f32 %v1291_v2, %v1127_v31  ;;  %v1772_v15 = vmul.f32 %v3144_v23, %v3447_v4  ;;  %v3469_v37 = vsel %vm866_vm4, %v1616_v60, %v1632_v58 }
 0x142   : > { %v2050_v32 = vpack.c.bf16 %v2021_v38, %v2020_v1  ;;  %v3475_v55 = vsel %vm866_vm4, %v1648_v33, %v1616_v60  ;;  %v1832_v10 = vrot.slane %v3445_v25, 1  ;;  %v1704_v0 = vmul.f32 %v3136_v20, %v3469_v37  ;;  %v3514_v1 = vld [vmem:[#allocation2 + $0x90] sm:$0xff]  ;;  %v3516_v38 = vld [vmem:[#allocation2 + $0x98] sm:$0xff] }
 0x143   : > { %v1390_v63 = vadd.f32 %v1358_v57, %v1322_v17  ;;  %v1391_v26 = vadd.f32 %v1359_v51, %v1323_v56  ;;  %v1703_v47 = vmul.f32 %v3136_v20, %v3475_v55  ;;  %v1848_v49 = vrot.slane %v3447_v4, 1 }
 0x144   : > { %2777 = vmatprep.mubr.msk.bf16.mxu1 %vm733_vm6, %v2050_v32  ;;  %v911_v14 = vmul.f32 %v3393_v6, %v3072_v35  ;;  %v912_v33 = vmul.f32 %v3387_v13, %v3072_v35  ;;  %v947_v62 = vmul.f32 %v3363_v53, %v3069_v34  ;;  %v948_v61 = vmul.f32 %v3365_v7, %v3069_v34 }
 0x145   : > { %v1538_v2 = vadd.f32 %v1506_v59, %v1390_v63  ;;  %v1539_v11 = vadd.f32 %v1507_v5, %v1391_v26  ;;  %v1096_v57 = vmul.f32 %v3413_v29, %v3083_v44  ;;  %v3498_v51 = vsel %vm1051_vm5, %v1848_v49, %v1864_v30 }
 0x146   : > { %v3502_v13 = vsel %vm1051_vm5, %v1832_v10, %v1848_v49  ;;  %v979_v6 = vadd.f32 %v947_v62, %v911_v14  ;;  %v1097_v53 = vmul.f32 %v3409_v50, %v3083_v44  ;;  %v1920_v16 = vmul.f32 %v3236_v8, %v3498_v51 }
 0x147   : > { %v1735_v54 = vadd.f32 %v1703_v47, %v1538_v2  ;;  %v1736_v31 = vadd.f32 %v1704_v0, %v1539_v11  ;;  %v1919_v7 = vmul.f32 %v3236_v8, %v3502_v13  ;;  %v980_v29 = vadd.f32 %v948_v61, %v912_v33 }
 0x148   : > { %v1128_v59 = vadd.f32 %v1096_v57, %v979_v6  ;;  %v1292_v30 = vmul.f32 %v3475_v55, %v3121_v12  ;;  %v1293_v5 = vmul.f32 %v3469_v37, %v3121_v12  ;;  %v1360_v58 = vmul.f32 %v3445_v25, %v3115_v9 }
 0x149   : > { %v1803_v50 = vadd.f32 %v1771_v43, %v1735_v54  ;;  %v1804_v60 = vadd.f32 %v1772_v15, %v1736_v31  ;;  %v1361_v17 = vmul.f32 %v3447_v4, %v3115_v9  ;;  %v1129_v56 = vadd.f32 %v1097_v53, %v980_v29 }
 0x14a   : > { %v1324_v32 = vadd.f32 %v1292_v30, %v1128_v59  ;;  %v1508_v10 = vmul.f32 %v3502_v13, %v3133_v19  ;;  %v1509_v63 = vmul.f32 %v3498_v51, %v3133_v19  ;;  %v1617_v0 = vrot.slane %v3514_v1, 7 }
 0x14b   : > { %v1951_v26 = vadd.f32 %v1919_v7, %v1803_v50  ;;  %v1952_v47 = vadd.f32 %v1920_v16, %v1804_v60  ;;  %v1633_v43 = vrot.slane %v3516_v38, 7  ;;  %v1325_v15 = vadd.f32 %v1293_v5, %v1129_v56 }
 0x14c   : > { %v1392_v49 = vadd.f32 %v1360_v58, %v1324_v32  ;;  %v1773_v14 = vmul.f32 %v3144_v23, %v3514_v1  ;;  %v1774_v33 = vmul.f32 %v3144_v23, %v3516_v38  ;;  %v3542_v61 = vsel %vm866_vm4, %v1649_v39, %v1617_v0 }
 0x14d   : > { %v1990_v62 = vadd.f32 %v3269_v18, %v1951_v26  ;;  %v1991_v2 = vadd.f32 %v3269_v18, %v1952_v47  ;;  %v3536_v11 = vsel %vm866_vm4, %v1617_v0, %v1633_v43  ;;  %v1393_v57 = vadd.f32 %v1361_v17, %v1325_v15 }
 0x14e   : > { %v1540_v6 = vadd.f32 %v1508_v10, %v1392_v49  ;;  %v1705_v53 = vmul.f32 %v3136_v20, %v3542_v61  ;;  %v1706_v54 = vmul.f32 %v3136_v20, %v3536_v11  ;;  %v1833_v16 = vrot.slane %v3514_v1, 1 }
 0x14f   : > { %v2022_v31 = vmax.f32 %v1990_v62, 0.0  ;;  %v2023_v7 = vmax.f32 %v1991_v2, 0.0  ;;  %v1849_v29 = vrot.slane %v3516_v38, 1  ;;  %v1541_v59 = vadd.f32 %v1509_v63, %v1393_v57  ;;  %v3598_v2 = vld [vmem:[#allocation2 + $0xb0] sm:$0xff] }
 0x150   : > { %v1737_v30 = vadd.f32 %v1705_v53, %v1540_v6  ;;  %v694_v39 = vadd.f32 %v3419_v52, %v3092_v48  ;;  %v686_v5 = vadd.f32 %v3092_v48, %v3431_v27  ;;  %v697_v17 = vadd.f32 %v3439_v3, %v3092_v48 }
 0x151   : > { %v2051_v50 = vpack.c.bf16 %v2023_v7, %v2022_v31  ;;  %v3558_v60 = vsel %vm1051_vm5, %v1849_v29, %v1865_v40  ;;  %v3562_v58 = vsel %vm1051_vm5, %v1833_v16, %v1849_v29  ;;  %v1738_v56 = vadd.f32 %v1706_v54, %v1541_v59 }
 0x152   : > { %v1805_v32 = vadd.f32 %v1773_v14, %v1737_v30  ;;  %v1921_v52 = vmul.f32 %v3236_v8, %v3562_v58  ;;  %v1922_v27 = vmul.f32 %v3236_v8, %v3558_v60  ;;  %v730_v21 = vmax.f32 %v694_v39, 0.0 }
 0x153   : > { %2778 = vmatmul.mubr.msk.bf16.gmra.mrb[20].mxu1 %vm733_vm6, %v2051_v50  ;;  %v728_v40 = vmax.f32 %v686_v5, 0.0  ;;  %v731_v10 = vmax.f32 %v697_v17, 0.0  ;;  %v689_v63 = vadd.f32 %v3092_v48, %v3449_v45  ;;  %v1806_v26 = vadd.f32 %v1774_v33, %v1738_v56  ;;  %v3591_v33 = vld [vmem:[#allocation2 + $0xa8] sm:$0xff] }
 0x154   : > { %v1953_v47 = vadd.f32 %v1921_v52, %v1805_v32  ;;  %v913_v3 = vmul.f32 %v3475_v55, %v3072_v35  ;;  %v914_v0 = vmul.f32 %v3469_v37, %v3072_v35  ;;  %764 = vst.msk [vmem:[#allocation2 + $0x180] sm:$0xff] %vm733_vm6, %v730_v21  ;;  %v949_v15 = vmul.f32 %v3445_v25, %v3069_v34 }
 0x155   : > { %762 = vst.msk [vmem:[#allocation2 + $0x168] sm:$0xff] %vm733_vm6, %v728_v40  ;;  %765 = vst.msk [vmem:[#allocation2 + $0x188] sm:$0xff] %vm733_vm6, %v731_v10  ;;  %v729_v43 = vmax.f32 %v689_v63, 0.0  ;;  %v950_v48 = vmul.f32 %v3447_v4, %v3069_v34  ;;  %v1098_v45 = vmul.f32 %v3502_v13, %v3083_v44  ;;  %v1954_v55 = vadd.f32 %v1922_v27, %v1806_v26 }
 0x156   : > { %v1992_v49 = vadd.f32 %v3269_v18, %v1953_v47  ;;  %v1099_v37 = vmul.f32 %v3498_v51, %v3083_v44  ;;  %v1294_v14 = vmul.f32 %v3542_v61, %v3121_v12  ;;  %v981_v25 = vadd.f32 %v949_v15, %v913_v3 }
 0x157   : > { %763 = vst.msk [vmem:[#allocation2 + $0x170] sm:$0xff] %vm733_vm6, %v729_v43  ;;  %v982_v62 = vadd.f32 %v950_v48, %v914_v0  ;;  %v1295_v4 = vmul.f32 %v3536_v11, %v3121_v12  ;;  %v1362_v13 = vmul.f32 %v3514_v1, %v3115_v9  ;;  %v1993_v57 = vadd.f32 %v3269_v18, %v1954_v55 }
 0x158   : > { %v2024_v51 = vmax.f32 %v1992_v49, 0.0  ;;  %v1363_v6 = vmul.f32 %v3516_v38, %v3115_v9  ;;  %v1510_v53 = vmul.f32 %v3562_v58, %v3133_v19  ;;  %v1130_v54 = vadd.f32 %v1098_v45, %v981_v25  ;;  %v3651_v25 = vld [vmem:[#allocation2 + $0xc8] sm:$0xff] }
 0x159   : > { %v1131_v31 = vadd.f32 %v1099_v37, %v982_v62  ;;  %v1511_v7 = vmul.f32 %v3558_v60, %v3133_v19  ;;  %v1618_v16 = vrot.slane %v3591_v33, 7  ;;  %v2025_v29 = vmax.f32 %v1993_v57, 0.0 }
 0x15a   : > { %v1634_v59 = vrot.slane %v3598_v2, 7  ;;  %v1775_v30 = vmul.f32 %v3144_v23, %v3591_v33  ;;  %v1776_v39 = vmul.f32 %v3144_v23, %v3598_v2  ;;  %v1326_v5 = vadd.f32 %v1294_v14, %v1130_v54  ;;  %v3649_v14 = vld [vmem:[#allocation2 + $0xc0] sm:$0xff] }
 0x15b   : > { %v1327_v50 = vadd.f32 %v1295_v4, %v1131_v31  ;;  %v1682_v17 = vsel %vm866_vm4, %v1650_v41, %v1618_v16  ;;  %v1834_v56 = vrot.slane %v3591_v33, 1  ;;  %v2052_v32 = vpack.c.bf16 %v2025_v29, %v2024_v51 }
 0x15c   : > { %v1666_v52 = vsel %vm866_vm4, %v1618_v16, %v1634_v59  ;;  %v1707_v27 = vmul.f32 %v3136_v20, %v1682_v17  ;;  %v1850_v21 = vrot.slane %v3598_v2, 1  ;;  %v1394_v40 = vadd.f32 %v1362_v13, %v1326_v5 }
 0x15d   : > { %v1395_v10 = vadd.f32 %v1363_v6, %v1327_v50  ;;  %v1708_v63 = vmul.f32 %v3136_v20, %v1666_v52  ;;  %v915_v26 = vmul.f32 %v3542_v61, %v3072_v35  ;;  %2781 = vmatprep.mubr.msk.bf16.mxu1 %vm733_vm6, %v2052_v32  ;;  %v916_v3 = vmul.f32 %v3536_v11, %v3072_v35 }
 0x15e   : > { %v3630_v41 = vsel %vm1051_vm5, %v1850_v21, %v1866_v46  ;;  %v1898_v47 = vsel %vm1051_vm5, %v1834_v56, %v1850_v21  ;;  %v951_v0 = vmul.f32 %v3514_v1, %v3069_v34  ;;  %v1542_v43 = vadd.f32 %v1510_v53, %v1394_v40 }
 0x15f   : > { %v1543_v15 = vadd.f32 %v1511_v7, %v1395_v10  ;;  %v1923_v61 = vmul.f32 %v3236_v8, %v1898_v47  ;;  %v1924_v22 = vmul.f32 %v3236_v8, %v3630_v41  ;;  %v952_v46 = vmul.f32 %v3516_v38, %v3069_v34  ;;  %v3662_v7 = vpop.f32.mrb[32].mxu0 }
 0x160   : > { %v983_v48 = vadd.f32 %v951_v0, %v915_v26  ;;  %v1100_v45 = vmul.f32 %v3562_v58, %v3083_v44  ;;  %v1101_v11 = vmul.f32 %v3558_v60, %v3083_v44  ;;  %v1739_v55 = vadd.f32 %v1707_v27, %v1542_v43 }
 0x161   : > { %v1740_v49 = vadd.f32 %v1708_v63, %v1543_v15  ;;  %v1296_v1 = vmul.f32 %v1682_v17, %v3121_v12  ;;  %v1297_v37 = vmul.f32 %v1666_v52, %v3121_v12  ;;  %v984_v62 = vadd.f32 %v952_v46, %v916_v3 }
 0x162   : > { %v1132_v4 = vadd.f32 %v1100_v45, %v983_v48  ;;  %v1364_v38 = vmul.f32 %v3591_v33, %v3115_v9  ;;  %v1365_v58 = vmul.f32 %v3598_v2, %v3115_v9  ;;  %v1807_v13 = vadd.f32 %v1775_v30, %v1739_v55 }
 0x163   : > { %v1808_v60 = vadd.f32 %v1776_v39, %v1740_v49  ;;  %v1512_v57 = vmul.f32 %v1898_v47, %v3133_v19  ;;  %v1513_v51 = vmul.f32 %v3630_v41, %v3133_v19  ;;  %v1133_v6 = vadd.f32 %v1101_v11, %v984_v62 }
 0x164   : > { %v1328_v53 = vadd.f32 %v1296_v1, %v1132_v4  ;;  %v1619_v54 = vrot.slane %v3649_v14, 7  ;;  %v1635_v31 = vrot.slane %v3651_v25, 7  ;;  %v1955_v16 = vadd.f32 %v1923_v61, %v1807_v13 }
 0x165   : > { %v1956_v29 = vadd.f32 %v1924_v22, %v1808_v60  ;;  %v1777_v59 = vmul.f32 %v3144_v23, %v3649_v14  ;;  %v1778_v30 = vmul.f32 %v3144_v23, %v3651_v25  ;;  %v1329_v39 = vadd.f32 %v1297_v37, %v1133_v6 }
 0x166   : > { %v1396_v5 = vadd.f32 %v1364_v38, %v1328_v53  ;;  %v3670_v50 = vsel %vm866_vm4, %v1619_v54, %v1635_v31  ;;  %v4332_v56 = vrot.slane %v3149_v28, 7  ;;  %v1994_v27 = vadd.f32 %v3269_v18, %v1955_v16 }
 0x167   : > { %v1995_v21 = vadd.f32 %v3269_v18, %v1956_v29  ;;  %v1710_v10 = vmul.f32 %v3136_v20, %v3670_v50  ;;  %v1397_v63 = vadd.f32 %v1365_v58, %v1329_v39  ;;  %v1835_v3 = vrot.slane %v3649_v14, 1 }
 0x168   : > { %v1683_v32 = vsel %vm866_vm4, %v4332_v56, %v1619_v54  ;;  %v1544_v26 = vadd.f32 %v1512_v57, %v1396_v5  ;;  %v1851_v0 = vrot.slane %v3651_v25, 1  ;;  %v2026_v43 = vmax.f32 %v1994_v27, 0.0  ;;  %v3704_v57 = vld [vmem:[#allocation2 + $0xd8] sm:$0xff] }
 0x169   : > { %v1709_v40 = vmul.f32 %v3136_v20, %v1683_v32  ;;  %v2027_v15 = vmax.f32 %v1995_v21, 0.0  ;;  %v917_v61 = vmul.f32 %v1682_v17, %v3072_v35  ;;  %v918_v22 = vmul.f32 %v1666_v52, %v3072_v35 }
 0x16a   : > { %v1545_v46 = vadd.f32 %v1513_v51, %v1397_v63  ;;  %v4333_v45 = vrot.slane %v3149_v28, 1  ;;  %v1899_v55 = vsel %vm1051_vm5, %v1835_v3, %v1851_v0  ;;  %v953_v17 = vmul.f32 %v3591_v33, %v3069_v34 }
 0x16b   : > { %v1741_v48 = vadd.f32 %v1709_v40, %v1544_v26  ;;  %v2053_v49 = vpack.c.bf16 %v2027_v15, %v2026_v43  ;;  %v1925_v1 = vmul.f32 %v3236_v8, %v1899_v55  ;;  %v954_v4 = vmul.f32 %v3598_v2, %v3069_v34 }
 0x16c   : > { %v1883_v11 = vsel %vm1051_vm5, %v1851_v0, %v4333_v45  ;;  %v1742_v62 = vadd.f32 %v1710_v10, %v1545_v46  ;;  %v1102_v28 = vmul.f32 %v1898_v47, %v3083_v44  ;;  %v985_v38 = vadd.f32 %v953_v17, %v917_v61  ;;  %v3708_v47 = vld [vmem:[#allocation2 + $0xe0] sm:$0xff] }
 0x16d   : > { %v1926_v37 = vmul.f32 %v3236_v8, %v1883_v11  ;;  %v1809_v52 = vadd.f32 %v1777_v59, %v1741_v48  ;;  %2782 = vmatmul.mubr.msk.bf16.gmra.mrb[24].mxu1 %vm733_vm6, %v2053_v49  ;;  %v1103_v58 = vmul.f32 %v3630_v41, %v3083_v44  ;;  %v1298_v13 = vmul.f32 %v1683_v32, %v3121_v12 }
 0x16e   : > { %v1299_v60 = vmul.f32 %v3670_v50, %v3121_v12  ;;  %v1810_v33 = vadd.f32 %v1778_v30, %v1742_v62  ;;  %v986_v6 = vadd.f32 %v954_v4, %v918_v22  ;;  %v1366_v2 = vmul.f32 %v3649_v14, %v3115_v9 }
 0x16f   : > { %v1957_v51 = vadd.f32 %v1925_v1, %v1809_v52  ;;  %v1134_v53 = vadd.f32 %v1102_v28, %v985_v38  ;;  %v1367_v54 = vmul.f32 %v3651_v25, %v3115_v9  ;;  %v1514_v41 = vmul.f32 %v1899_v55, %v3133_v19 }
 0x170   : > { %v1515_v31 = vmul.f32 %v1883_v11, %v3133_v19  ;;  %v1958_v16 = vadd.f32 %v1926_v37, %v1810_v33  ;;  %v1135_v59 = vadd.f32 %v1103_v58, %v986_v6  ;;  %v1620_v30 = vrot.slane %v3704_v57, 7 }
 0x171   : > { %v1996_v29 = vadd.f32 %v3269_v18, %v1957_v51  ;;  %v1330_v39 = vadd.f32 %v1298_v13, %v1134_v53  ;;  %v1636_v5 = vrot.slane %v3708_v47, 7  ;;  %v1779_v56 = vmul.f32 %v3144_v23, %v3704_v57  ;;  %v3752_v53 = vld [vmem:[#allocation2 + $0xf0] sm:$0xff] }
 0x172   : > { %v1780_v27 = vmul.f32 %v3144_v23, %v3708_v47  ;;  %v1997_v21 = vadd.f32 %v3269_v18, %v1958_v16  ;;  %v1331_v10 = vadd.f32 %v1299_v60, %v1135_v59  ;;  %v4334_v63 = vrot.slane %v3156_v36, 7 }
 0x173   : > { %v2028_v40 = vmax.f32 %v1996_v29, 0.0  ;;  %v1398_v3 = vadd.f32 %v1366_v2, %v1330_v39  ;;  %v1668_v0 = vsel %vm866_vm4, %v1620_v30, %v1636_v5  ;;  %v1836_v15 = vrot.slane %v3704_v57, 1 }
 0x174   : > { %v1684_v26 = vsel %vm866_vm4, %v4334_v63, %v1620_v30  ;;  %v2029_v61 = vmax.f32 %v1997_v21, 0.0  ;;  %v1399_v22 = vadd.f32 %v1367_v54, %v1331_v10  ;;  %v1712_v46 = vmul.f32 %v3136_v20, %v1668_v0  ;;  %v3754_v54 = vld [vmem:[#allocation2 + $0xf8] sm:$0xff] }
 0x175   : > { %v1711_v43 = vmul.f32 %v3136_v20, %v1684_v26  ;;  %v1852_v48 = vrot.slane %v3708_v47, 1  ;;  %v1546_v45 = vadd.f32 %v1514_v41, %v1398_v3  ;;  %v919_v49 = vmul.f32 %v1683_v32, %v3072_v35 }
 0x176   : > { %v920_v1 = vmul.f32 %v3670_v50, %v3072_v35  ;;  %v955_v37 = vmul.f32 %v3649_v14, %v3069_v34  ;;  %v2054_v17 = vpack.c.bf16 %v2029_v61, %v2028_v40  ;;  %v1547_v62 = vadd.f32 %v1515_v31, %v1399_v22 }
 0x177   : > { %v4335_v52 = vrot.slane %v3156_v36, 1  ;;  %v1900_v28 = vsel %vm1051_vm5, %v1836_v15, %v1852_v48  ;;  %v1743_v38 = vadd.f32 %v1711_v43, %v1546_v45  ;;  %v956_v50 = vmul.f32 %v3651_v25, %v3069_v34 }
 0x178   : > { %v1927_v58 = vmul.f32 %v3236_v8, %v1900_v28  ;;  %2785 = vmatprep.mubr.msk.bf16.mxu1 %vm733_vm6, %v2054_v17  ;;  %v1744_v14 = vadd.f32 %v1712_v46, %v1547_v62  ;;  %v987_v13 = vadd.f32 %v955_v37, %v919_v49  ;;  %v1104_v36 = vmul.f32 %v1899_v55, %v3083_v44 }
 0x179   : > { %v1884_v4 = vsel %vm1051_vm5, %v1852_v48, %v4335_v52  ;;  %v1105_v60 = vmul.f32 %v1883_v11, %v3083_v44  ;;  %v1811_v33 = vadd.f32 %v1779_v56, %v1743_v38  ;;  %v988_v51 = vadd.f32 %v956_v50, %v920_v1 }
 0x17a   : > { %v1928_v32 = vmul.f32 %v3236_v8, %v1884_v4  ;;  %v1300_v6 = vmul.f32 %v1684_v26, %v3121_v12  ;;  %v1301_v2 = vmul.f32 %v1668_v0, %v3121_v12  ;;  %v1812_v41 = vadd.f32 %v1780_v27, %v1744_v14 }
 0x17b   : > { %v1136_v25 = vadd.f32 %v1104_v36, %v987_v13  ;;  %v1368_v31 = vmul.f32 %v3704_v57, %v3115_v9  ;;  %v1369_v55 = vmul.f32 %v3708_v47, %v3115_v9  ;;  %v1959_v16 = vadd.f32 %v1927_v58, %v1811_v33 }
 0x17c   : > { %v1137_v11 = vadd.f32 %v1105_v60, %v988_v51  ;;  %v1516_v29 = vmul.f32 %v1900_v28, %v3133_v19  ;;  %v1517_v59 = vmul.f32 %v1884_v4, %v3133_v19  ;;  %v1960_v30 = vadd.f32 %v1928_v32, %v1812_v41 }
 0x17d   : > { %v1332_v39 = vadd.f32 %v1300_v6, %v1136_v25  ;;  %v1621_v5 = vrot.slane %v3752_v53, 7  ;;  %v1637_v56 = vrot.slane %v3754_v54, 7  ;;  %v1998_v27 = vadd.f32 %v3269_v18, %v1959_v16 }
 0x17e   : > { %v1333_v21 = vadd.f32 %v1301_v2, %v1137_v11  ;;  %v1781_v40 = vmul.f32 %v3144_v23, %v3752_v53  ;;  %v1782_v10 = vmul.f32 %v3144_v23, %v3754_v54  ;;  %v1999_v63 = vadd.f32 %v3269_v18, %v1960_v30 }
 0x17f   : > { %v1400_v3 = vadd.f32 %v1368_v31, %v1332_v39  ;;  %v3772_v43 = vsel %vm866_vm4, %v1621_v5, %v1637_v56  ;;  %v4336_v15 = vrot.slane %v3162_v42, 7  ;;  %v2030_v22 = vmax.f32 %v1998_v27, 0.0 }
 0x180   : > { %v1401_v46 = vadd.f32 %v1369_v55, %v1333_v21  ;;  %v1714_v45 = vmul.f32 %v3136_v20, %v3772_v43  ;;  %v2031_v49 = vmax.f32 %v1999_v63, 0.0  ;;  %v1837_v37 = vrot.slane %v3752_v53, 1  ;;  %v3815_v55 = vld [vmem:[#allocation2 + $0x110] sm:$0xff] }
 0x181   : > { %v3778_v61 = vsel %vm866_vm4, %v4336_v15, %v1621_v5  ;;  %v1548_v1 = vadd.f32 %v1516_v29, %v1400_v3  ;;  %v1853_v17 = vrot.slane %v3754_v54, 1  ;;  %v921_v52 = vmul.f32 %v1684_v26, %v3072_v35 }
 0x182   : > { %v1713_v48 = vmul.f32 %v3136_v20, %v3778_v61  ;;  %v1549_v62 = vadd.f32 %v1517_v59, %v1401_v46  ;;  %v922_v38 = vmul.f32 %v1668_v0, %v3072_v35  ;;  %v957_v58 = vmul.f32 %v3704_v57, %v3069_v34 }
 0x183   : > { %v2055_v32 = vpack.c.bf16 %v2031_v49, %v2030_v22  ;;  %v4337_v14 = vrot.slane %v3162_v42, 1  ;;  %v3798_v36 = vsel %vm1051_vm5, %v1837_v37, %v1853_v17  ;;  %v958_v57 = vmul.f32 %v3708_v47, %v3069_v34 }
 0x184   : > { %v1745_v50 = vadd.f32 %v1713_v48, %v1548_v1  ;;  %v1746_v60 = vadd.f32 %v1714_v45, %v1549_v62  ;;  %v1929_v26 = vmul.f32 %v3236_v8, %v3798_v36  ;;  %v989_v33 = vadd.f32 %v957_v58, %v921_v52 }
 0x185   : > { %v3794_v13 = vsel %vm1051_vm5, %v1853_v17, %v4337_v14  ;;  %2786 = vmatmul.mubr.msk.bf16.gmra.mrb[28].mxu1 %vm733_vm6, %v2055_v32  ;;  %v1106_v51 = vmul.f32 %v1900_v28, %v3083_v44  ;;  %v1107_v6 = vmul.f32 %v1884_v4, %v3083_v44  ;;  %v990_v41 = vadd.f32 %v958_v57, %v922_v38  ;;  %v1594_v28 = vld [vmem:[#allocation2 + $0x118] sm:$0xff] }
 0x186   : > { %v1930_v0 = vmul.f32 %v3236_v8, %v3794_v13  ;;  %v1813_v42 = vadd.f32 %v1781_v40, %v1745_v50  ;;  %v1814_v2 = vadd.f32 %v1782_v10, %v1746_v60  ;;  %v1302_v25 = vmul.f32 %v3778_v61, %v3121_v12  ;;  %v3813_v8 = vld [vmem:[#allocation2 + $0x108] sm:$0xff] }
 0x187   : > { %v1303_v31 = vmul.f32 %v3772_v43, %v3121_v12  ;;  %v1138_v16 = vadd.f32 %v1106_v51, %v989_v33  ;;  %v1370_v11 = vmul.f32 %v3752_v53, %v3115_v9  ;;  %v1371_v4 = vmul.f32 %v3754_v54, %v3115_v9  ;;  %v3871_v51 = vpop.f32.mrb[33].mxu0 }
 0x188   : > { %v1961_v47 = vadd.f32 %v1929_v26, %v1813_v42  ;;  %v1962_v29 = vadd.f32 %v1930_v0, %v1814_v2  ;;  %v1139_v59 = vadd.f32 %v1107_v6, %v990_v41  ;;  %v1518_v30 = vmul.f32 %v3798_v36, %v3133_v19 }
 0x189   : > { %v1519_v39 = vmul.f32 %v3794_v13, %v3133_v19  ;;  %v1334_v56 = vadd.f32 %v1302_v25, %v1138_v16  ;;  %v1622_v27 = vrot.slane %v3813_v8, 7  ;;  %v1638_v21 = vrot.slane %v3815_v55, 7  ;;  %v3877_v25 = vpop.f32.mrb[34].mxu0 }
 0x18a   : > { %v2000_v5 = vadd.f32 %v3269_v18, %v1961_v47  ;;  %v2001_v40 = vadd.f32 %v3269_v18, %v1962_v29  ;;  %v1335_v10 = vadd.f32 %v1303_v31, %v1139_v59  ;;  %v1654_v63 = vrot.slane %v1594_v28, 7 }
 0x18b   : > { %v1783_v3 = vmul.f32 %v3144_v23, %v3813_v8  ;;  %v1402_v22 = vadd.f32 %v1370_v11, %v1334_v56  ;;  %v3833_v46 = vsel %vm866_vm4, %v1622_v27, %v1638_v21  ;;  %v1784_v48 = vmul.f32 %v3144_v23, %v3815_v55  ;;  %v3883_v11 = vld [vmem:[#allocation2 + $0x120] sm:$0xff] }
 0x18c   : > { %v2032_v15 = vmax.f32 %v2000_v5, 0.0  ;;  %v2033_v45 = vmax.f32 %v2001_v40, 0.0  ;;  %v1403_v49 = vadd.f32 %v1371_v4, %v1335_v10  ;;  %v3839_v1 = vsel %vm866_vm4, %v1654_v63, %v1622_v27  ;;  %v3885_v4 = vpop.f32.mrb[35].mxu0  ;;  %v3902_v40 = vld [vmem:[%s4327_s4] ss:$0 sm:$0xff] }
 0x18d   : > { %v1716_v18 = vmul.f32 %v3136_v20, %v3833_v46  ;;  %v1550_v37 = vadd.f32 %v1518_v30, %v1402_v22  ;;  %v1715_v17 = vmul.f32 %v3136_v20, %v3839_v1  ;;  %v1838_v62 = vrot.slane %v3813_v8, 1  ;;  %v3891_v30 = vld [vmem:[#allocation2 + $0x128] sm:$0xff]  ;;  %v3893_v5 = vpop.f32.mrb[36].mxu0 }
 0x18e   : > { %v1854_v52 = vrot.slane %v3815_v55, 1  ;;  %v2056_v38 = vpack.c.bf16 %v2033_v45, %v2032_v15  ;;  %v1551_v58 = vadd.f32 %v1519_v39, %v1403_v49  ;;  %v1870_v32 = vrot.slane %v1594_v28, 1  ;;  %v1597_v39 = vld [vmem:[#allocation2 + $0x130] sm:$0xff] }
 0x18f   : > { %v923_v50 = vmul.f32 %v3778_v61, %v3072_v35  ;;  %v1747_v14 = vadd.f32 %v1715_v17, %v1550_v37  ;;  %v924_v26 = vmul.f32 %v3772_v43, %v3072_v35  ;;  %v959_v0 = vmul.f32 %v3752_v53, %v3069_v34  ;;  %v3865_v61 = vld [vmem:[%s4326_s3 + $0x8] ss:$0 sm:$0xff] }
 0x190   : > { %v3851_v60 = vsel %vm1051_vm5, %v1838_v62, %v1854_v52  ;;  %2789 = vmatprep.mubr.msk.bf16.mxu1 %vm733_vm6, %v2056_v38  ;;  %v1748_v57 = vadd.f32 %v1716_v18, %v1551_v58  ;;  %v3860_v42 = vsel %vm1051_vm5, %v1854_v52, %v1870_v32  ;;  %v960_v43 = vmul.f32 %v3754_v54, %v3069_v34 }
 0x191   : > { %v1931_v33 = vmul.f32 %v3865_v61, %v3851_v60  ;;  %v1815_v53 = vadd.f32 %v1783_v3, %v1747_v14  ;;  %v1932_v6 = vmul.f32 %v3865_v61, %v3860_v42  ;;  %v991_v2 = vadd.f32 %v959_v0, %v923_v50 }
 0x192   : > { %v1108_v41 = vmul.f32 %v3798_v36, %v3083_v44  ;;  %v1816_v31 = vadd.f32 %v1784_v48, %v1748_v57  ;;  %v992_v47 = vadd.f32 %v960_v43, %v924_v26  ;;  %v1109_v16 = vmul.f32 %v3794_v13, %v3083_v44 }
 0x193   : > { %v1304_v54 = vmul.f32 %v3839_v1, %v3121_v12  ;;  %v1963_v28 = vadd.f32 %v1931_v33, %v1815_v53  ;;  %v1305_v59 = vmul.f32 %v3833_v46, %v3121_v12  ;;  %v1372_v36 = vmul.f32 %v3813_v8, %v3115_v9 }
 0x194   : > { %v1140_v29 = vadd.f32 %v1108_v41, %v991_v2  ;;  %v1964_v13 = vadd.f32 %v1932_v6, %v1816_v31  ;;  %v1141_v56 = vadd.f32 %v1109_v16, %v992_v47  ;;  %v1373_v27 = vmul.f32 %v3815_v55, %v3115_v9 }
 0x195   : > { %v1520_v21 = vmul.f32 %v3851_v60, %v3133_v19  ;;  %v2002_v10 = vadd.f32 %v3902_v40, %v1963_v28  ;;  %v1521_v3 = vmul.f32 %v3860_v42, %v3133_v19  ;;  %v1623_v15 = vrot.slane %v3883_v11, 7 }
 0x196   : > { %v1336_v63 = vadd.f32 %v1304_v54, %v1140_v29  ;;  %v2003_v22 = vadd.f32 %v3902_v40, %v1964_v13  ;;  %v1337_v48 = vadd.f32 %v1305_v59, %v1141_v56  ;;  %v1639_v45 = vrot.slane %v3891_v30, 7  ;;  %v3947_v56 = vld [vmem:[#allocation2 + $0x138] sm:$0xff] }
 0x197   : > { %v1655_v49 = vrot.slane %v1597_v39, 7  ;;  %v2034_v18 = vmax.f32 %v2002_v10, 0.0  ;;  %v1785_v17 = vmul.f32 %v3144_v23, %v3883_v11  ;;  %v1786_v62 = vmul.f32 %v3144_v23, %v3891_v30 }
 0x198   : > { %v1404_v37 = vadd.f32 %v1372_v36, %v1336_v63  ;;  %v2035_v52 = vmax.f32 %v2003_v22, 0.0  ;;  %v1405_v38 = vadd.f32 %v1373_v27, %v1337_v48  ;;  %v3916_v58 = vsel %vm866_vm4, %v1623_v15, %v1639_v45  ;;  %v3955_v63 = vld [vmem:[#allocation2 + $0x140] sm:$0xff]  ;;  %v1600_v22 = vld [vmem:[#allocation2 + $0x148] sm:$0xff] }
 0x199   : > { %v3920_v32 = vsel %vm866_vm4, %v1655_v49, %v1623_v15  ;;  %v1718_v26 = vmul.f32 %v3136_v20, %v3916_v58  ;;  %v1839_v0 = vrot.slane %v3883_v11, 1  ;;  %v1855_v43 = vrot.slane %v3891_v30, 1 }
 0x19a   : > { %v1552_v50 = vadd.f32 %v1520_v21, %v1404_v37  ;;  %v1717_v14 = vmul.f32 %v3136_v20, %v3920_v32  ;;  %v2057_v57 = vpack.c.bf16 %v2035_v52, %v2034_v18  ;;  %v1553_v33 = vadd.f32 %v1521_v3, %v1405_v38 }
 0x19b   : > { %v1871_v53 = vrot.slane %v1597_v39, 1  ;;  %v925_v2 = vmul.f32 %v3839_v1, %v3072_v35  ;;  %v926_v41 = vmul.f32 %v3833_v46, %v3072_v35  ;;  %v961_v31 = vmul.f32 %v3813_v8, %v3069_v34 }
 0x19c   : > { %v1749_v6 = vadd.f32 %v1717_v14, %v1552_v50  ;;  %2790 = vmatmul.mubr.msk.bf16.gmra.mrb[0].mxu1 %vm733_vm6, %v2057_v57  ;;  %v1750_v47 = vadd.f32 %v1718_v26, %v1553_v33  ;;  %v1903_v54 = vsel %vm1051_vm5, %v1839_v0, %v1855_v43  ;;  %v962_v28 = vmul.f32 %v3815_v55, %v3069_v34 }
 0x19d   : > { %v1887_v16 = vsel %vm1051_vm5, %v1855_v43, %v1871_v53  ;;  %v1933_v1 = vmul.f32 %v3865_v61, %v1903_v54  ;;  %v993_v59 = vadd.f32 %v961_v31, %v925_v2  ;;  %v1110_v39 = vmul.f32 %v3851_v60, %v3083_v44 }
 0x19e   : > { %v1817_v29 = vadd.f32 %v1785_v17, %v1749_v6  ;;  %v1934_v46 = vmul.f32 %v3865_v61, %v1887_v16  ;;  %v1818_v36 = vadd.f32 %v1786_v62, %v1750_v47  ;;  %v994_v8 = vadd.f32 %v962_v28, %v926_v41 }
 0x19f   : > { %v1111_v13 = vmul.f32 %v3860_v42, %v3083_v44  ;;  %v1306_v55 = vmul.f32 %v3920_v32, %v3121_v12  ;;  %v1307_v21 = vmul.f32 %v3916_v58, %v3121_v12  ;;  %v1374_v10 = vmul.f32 %v3883_v11, %v3115_v9 }
 0x1a0   : > { %v1965_v27 = vadd.f32 %v1933_v1, %v1817_v29  ;;  %v1966_v3 = vadd.f32 %v1934_v46, %v1818_v36  ;;  %v1142_v15 = vadd.f32 %v1110_v39, %v993_v59  ;;  %v1375_v42 = vmul.f32 %v3891_v30, %v3115_v9 }
 0x1a1   : > { %v1143_v60 = vadd.f32 %v1111_v13, %v994_v8  ;;  %v1522_v45 = vmul.f32 %v1903_v54, %v3133_v19  ;;  %v1523_v49 = vmul.f32 %v1887_v16, %v3133_v19  ;;  %v1624_v18 = vrot.slane %v3947_v56, 7 }
 0x1a2   : > { %v2004_v48 = vadd.f32 %v3902_v40, %v1965_v27  ;;  %v2005_v37 = vadd.f32 %v3902_v40, %v1966_v3  ;;  %v1338_v17 = vadd.f32 %v1306_v55, %v1142_v15  ;;  %v1640_v52 = vrot.slane %v3955_v63, 7 }
 0x1a3   : > { %v1339_v62 = vadd.f32 %v1307_v21, %v1143_v60  ;;  %v1656_v50 = vrot.slane %v1600_v22, 7  ;;  %v1787_v14 = vmul.f32 %v3144_v23, %v3947_v56  ;;  %v1788_v26 = vmul.f32 %v3144_v23, %v3955_v63 }
 0x1a4   : > { %v2036_v38 = vmax.f32 %v2004_v48, 0.0  ;;  %v2037_v0 = vmax.f32 %v2005_v37, 0.0  ;;  %v1406_v57 = vadd.f32 %v1374_v10, %v1338_v17  ;;  %v3971_v43 = vsel %vm866_vm4, %v1624_v18, %v1640_v52  ;;  %v1603_v37 = vld [vmem:[#allocation2 + $0x160] sm:$0xff]  ;;  %v4018_v17 = vpop.f32.mrb[37].mxu0 }
 0x1a5   : > { %v1407_v33 = vadd.f32 %v1375_v42, %v1339_v62  ;;  %v3975_v53 = vsel %vm866_vm4, %v1656_v50, %v1624_v18  ;;  %v1720_v6 = vmul.f32 %v3136_v20, %v3971_v43  ;;  %v1840_v2 = vrot.slane %v3947_v56, 1  ;;  %v4006_v42 = vld [vmem:[#allocation2 + $0x150] sm:$0xff] }
 0x1a6   : > { %v1856_v41 = vrot.slane %v3955_v63, 1  ;;  %v2058_v31 = vpack.c.bf16 %v2037_v0, %v2036_v38  ;;  %v1554_v47 = vadd.f32 %v1522_v45, %v1406_v57  ;;  %v1719_v29 = vmul.f32 %v3136_v20, %v3975_v53 }
 0x1a7   : > { %v1555_v28 = vadd.f32 %v1523_v49, %v1407_v33  ;;  %v1872_v1 = vrot.slane %v1600_v22, 1  ;;  %v927_v59 = vmul.f32 %v3920_v32, %v3072_v35  ;;  %v928_v36 = vmul.f32 %v3916_v58, %v3072_v35 }
 0x1a8   : > { %v3985_v46 = vsel %vm1051_vm5, %v1840_v2, %v1856_v41  ;;  %2793 = vmatprep.mubr.msk.bf16.mxu1 %vm733_vm6, %v2058_v31  ;;  %v1751_v8 = vadd.f32 %v1719_v29, %v1554_v47  ;;  %v963_v27 = vmul.f32 %v3883_v11, %v3069_v34  ;;  %v964_v32 = vmul.f32 %v3891_v30, %v3069_v34 }
 0x1a9   : > { %v1752_v39 = vadd.f32 %v1720_v6, %v1555_v28  ;;  %v1935_v13 = vmul.f32 %v3865_v61, %v3985_v46  ;;  %v3998_v55 = vsel %vm1051_vm5, %v1856_v41, %v1872_v1  ;;  %v1112_v21 = vmul.f32 %v1903_v54, %v3083_v44  ;;  %v4014_v54 = vld [vmem:[#allocation2 + $0x158] sm:$0xff] }
 0x1aa   : > { %v1113_v58 = vmul.f32 %v1887_v16, %v3083_v44  ;;  %v1819_v10 = vadd.f32 %v1787_v14, %v1751_v8  ;;  %v1936_v15 = vmul.f32 %v3865_v61, %v3998_v55  ;;  %v995_v60 = vadd.f32 %v963_v27, %v927_v59  ;;  %v4025_v14 = vpop.f32.mrb[38].mxu0 }
 0x1ab   : > { %v1820_v3 = vadd.f32 %v1788_v26, %v1752_v39  ;;  %v996_v11 = vadd.f32 %v964_v32, %v928_v36  ;;  %v1308_v22 = vmul.f32 %v3975_v53, %v3121_v12  ;;  %v1309_v48 = vmul.f32 %v3971_v43, %v3121_v12  ;;  %v4030_v6 = vpop.f32.mrb[39].mxu0 }
 0x1ac   : > { %v1376_v30 = vmul.f32 %v3947_v56, %v3115_v9  ;;  %v1967_v16 = vadd.f32 %v1935_v13, %v1819_v10  ;;  %v1144_v49 = vadd.f32 %v1112_v21, %v995_v60  ;;  %v1377_v18 = vmul.f32 %v3955_v63, %v3115_v9  ;;  %v4036_v28 = vpop.f32.mrb[40].mxu0 }
 0x1ad   : > { %v1968_v45 = vadd.f32 %v1936_v15, %v1820_v3  ;;  %v1145_v62 = vadd.f32 %v1113_v58, %v996_v11  ;;  %v1524_v52 = vmul.f32 %v3985_v46, %v3133_v19  ;;  %v1525_v38 = vmul.f32 %v3998_v55, %v3133_v19 }
 0x1ae   : > { %v1625_v50 = vrot.slane %v4006_v42, 7  ;;  %v2006_v26 = vadd.f32 %v3902_v40, %v1967_v16  ;;  %v1340_v57 = vadd.f32 %v1308_v22, %v1144_v49  ;;  %v1641_v33 = vrot.slane %v4014_v54, 7 }
 0x1af   : > { %v2007_v0 = vadd.f32 %v3902_v40, %v1968_v45  ;;  %v1341_v2 = vadd.f32 %v1309_v48, %v1145_v62  ;;  %v1657_v41 = vrot.slane %v1603_v37, 7  ;;  %v1789_v31 = vmul.f32 %v3144_v23, %v4006_v42 }
 0x1b0   : > { %v1790_v47 = vmul.f32 %v3144_v23, %v4014_v54  ;;  %v2038_v29 = vmax.f32 %v2006_v26, 0.0  ;;  %v1408_v59 = vadd.f32 %v1376_v30, %v1340_v57  ;;  %v4040_v36 = vsel %vm866_vm4, %v1625_v50, %v1641_v33  ;;  %v4071_v26 = vld [vmem:[#allocation2 + $0x168] sm:$0xff] }
 0x1b1   : > { %v2039_v1 = vmax.f32 %v2007_v0, 0.0  ;;  %v1409_v8 = vadd.f32 %v1377_v18, %v1341_v2  ;;  %v1689_v39 = vsel %vm866_vm4, %v1657_v41, %v1625_v50  ;;  %v1722_v13 = vmul.f32 %v3136_v20, %v4040_v36  ;;  %v4073_v0 = vld [vmem:[#allocation2 + $0x170] sm:$0xff]  ;;  %v1606_v41 = vld [vmem:[#allocation2 + $0x178] sm:$0xff] }
 0x1b2   : > { %v1841_v27 = vrot.slane %v4006_v42, 1  ;;  %v1556_v21 = vadd.f32 %v1524_v52, %v1408_v59  ;;  %v1721_v58 = vmul.f32 %v3136_v20, %v1689_v39  ;;  %v1857_v10 = vrot.slane %v4014_v54, 1 }
 0x1b3   : > { %v2059_v32 = vpack.c.bf16 %v2039_v1, %v2038_v29  ;;  %v1557_v3 = vadd.f32 %v1525_v38, %v1409_v8  ;;  %v1873_v15 = vrot.slane %v1603_v37, 1  ;;  %v929_v60 = vmul.f32 %v3975_v53, %v3072_v35 }
 0x1b4   : > { %v930_v11 = vmul.f32 %v3971_v43, %v3072_v35  ;;  %v1753_v22 = vadd.f32 %v1721_v58, %v1556_v21  ;;  %v1905_v48 = vsel %vm1051_vm5, %v1841_v27, %v1857_v10  ;;  %v965_v30 = vmul.f32 %v3947_v56, %v3069_v34 }
 0x1b5   : > { %2794 = vmatmul.mubr.msk.bf16.gmra.mrb[4].mxu1 %vm733_vm6, %v2059_v32  ;;  %v966_v16 = vmul.f32 %v3955_v63, %v3069_v34  ;;  %v1754_v45 = vadd.f32 %v1722_v13, %v1557_v3  ;;  %v1889_v49 = vsel %vm1051_vm5, %v1857_v10, %v1873_v15  ;;  %v1937_v53 = vmul.f32 %v3865_v61, %v1905_v48 }
 0x1b6   : > { %v1114_v43 = vmul.f32 %v3985_v46, %v3083_v44  ;;  %v1821_v18 = vadd.f32 %v1789_v31, %v1753_v22  ;;  %v1938_v37 = vmul.f32 %v3865_v61, %v1889_v49  ;;  %v997_v62 = vadd.f32 %v965_v30, %v929_v60 }
 0x1b7   : > { %v998_v52 = vadd.f32 %v966_v16, %v930_v11  ;;  %v1822_v38 = vadd.f32 %v1790_v47, %v1754_v45  ;;  %v1115_v56 = vmul.f32 %v3998_v55, %v3083_v44  ;;  %v1310_v63 = vmul.f32 %v1689_v39, %v3121_v12 }
 0x1b8   : > { %v1311_v50 = vmul.f32 %v4040_v36, %v3121_v12  ;;  %v1969_v57 = vadd.f32 %v1937_v53, %v1821_v18  ;;  %v1146_v46 = vadd.f32 %v1114_v43, %v997_v62  ;;  %v1378_v33 = vmul.f32 %v4006_v42, %v3115_v9 }
 0x1b9   : > { %v1379_v2 = vmul.f32 %v4014_v54, %v3115_v9  ;;  %v1970_v31 = vadd.f32 %v1938_v37, %v1822_v38  ;;  %v1147_v55 = vadd.f32 %v1115_v56, %v998_v52  ;;  %v1526_v47 = vmul.f32 %v1905_v48, %v3133_v19 }
 0x1ba   : > { %v1527_v29 = vmul.f32 %v1889_v49, %v3133_v19  ;;  %v2008_v1 = vadd.f32 %v3902_v40, %v1969_v57  ;;  %v1342_v59 = vadd.f32 %v1310_v63, %v1146_v46  ;;  %v1626_v8 = vrot.slane %v4071_v26, 7 }
 0x1bb   : > { %v1642_v13 = vrot.slane %v4073_v0, 7  ;;  %v2009_v27 = vadd.f32 %v3902_v40, %v1970_v31  ;;  %v1343_v32 = vadd.f32 %v1311_v50, %v1147_v55  ;;  %v1658_v21 = vrot.slane %v1606_v41, 7 }
 0x1bc   : > { %v1791_v58 = vmul.f32 %v3144_v23, %v4071_v26  ;;  %v2040_v10 = vmax.f32 %v2008_v1, 0.0  ;;  %v1410_v3 = vadd.f32 %v1378_v33, %v1342_v59  ;;  %v1792_v60 = vmul.f32 %v3144_v23, %v4073_v0  ;;  %v1607_v59 = vld [vmem:[#allocation2 + $0x180] sm:$0xff] }
 0x1bd   : > { %v4089_v15 = vsel %vm866_vm4, %v1626_v8, %v1642_v13  ;;  %v2041_v11 = vmax.f32 %v2009_v27, 0.0  ;;  %v1411_v22 = vadd.f32 %v1379_v2, %v1343_v32  ;;  %v4095_v30 = vsel %vm866_vm4, %v1658_v21, %v1626_v8  ;;  %v1608_v32 = vld [vmem:[#allocation2 + $0x188] sm:$0xff]  ;;  %v1609_v21 = vld [vmem:[#allocation2 + $0x190] sm:$0xff] }
 0x1be   : > { %v1724_v16 = vmul.f32 %v3136_v20, %v4089_v15  ;;  %v1558_v45 = vadd.f32 %v1526_v47, %v1410_v3  ;;  %v1723_v53 = vmul.f32 %v3136_v20, %v4095_v30  ;;  %v1842_v43 = vrot.slane %v4071_v26, 1 }
 0x1bf   : > { %v1858_v18 = vrot.slane %v4073_v0, 1  ;;  %v2060_v37 = vpack.c.bf16 %v2041_v11, %v2040_v10  ;;  %v1559_v62 = vadd.f32 %v1527_v29, %v1411_v22  ;;  %v1874_v52 = vrot.slane %v1606_v41, 1 }
 0x1c0   : > { %v931_v38 = vmul.f32 %v1689_v39, %v3072_v35  ;;  %v1755_v56 = vadd.f32 %v1723_v53, %v1558_v45  ;;  %v932_v50 = vmul.f32 %v4040_v36, %v3072_v35  ;;  %v967_v57 = vmul.f32 %v4006_v42, %v3069_v34 }
 0x1c1   : > { %v4106_v63 = vsel %vm1051_vm5, %v1842_v43, %v1858_v18  ;;  %2797 = vmatprep.mubr.msk.bf16.mxu1 %vm733_vm6, %v2060_v37  ;;  %v1756_v46 = vadd.f32 %v1724_v16, %v1559_v62  ;;  %v4115_v33 = vsel %vm1051_vm5, %v1858_v18, %v1874_v52  ;;  %v968_v2 = vmul.f32 %v4014_v54, %v3069_v34  ;;  %v4138_v16 = vpop.f32.mrb[41].mxu0 }
 0x1c2   : > { %v1939_v39 = vmul.f32 %v3865_v61, %v4106_v63  ;;  %v1823_v41 = vadd.f32 %v1791_v58, %v1755_v56  ;;  %v1940_v36 = vmul.f32 %v3865_v61, %v4115_v33  ;;  %v999_v31 = vadd.f32 %v967_v57, %v931_v38  ;;  %v4141_v37 = vpop.f32.mrb[42].mxu0 }
 0x1c3   : > { %v1116_v42 = vmul.f32 %v1905_v48, %v3083_v44  ;;  %v1824_v55 = vadd.f32 %v1792_v60, %v1756_v46  ;;  %v1000_v47 = vadd.f32 %v968_v2, %v932_v50  ;;  %v1117_v29 = vmul.f32 %v1889_v49, %v3083_v44  ;;  %v4145_v50 = vpop.f32.mrb[43].mxu0 }
 0x1c4   : > { %v1312_v1 = vmul.f32 %v4095_v30, %v3121_v12  ;;  %v1971_v8 = vadd.f32 %v1939_v39, %v1823_v41  ;;  %v1313_v54 = vmul.f32 %v4089_v15, %v3121_v12  ;;  %v1380_v27 = vmul.f32 %v4071_v26, %v3115_v9  ;;  %v4151_v41 = vpop.f32.mrb[44].mxu0 }
 0x1c5   : > { %v1148_v13 = vadd.f32 %v1116_v42, %v999_v31  ;;  %v1972_v58 = vadd.f32 %v1940_v36, %v1824_v55  ;;  %v1149_v48 = vadd.f32 %v1117_v29, %v1000_v47  ;;  %v1381_v10 = vmul.f32 %v4073_v0, %v3115_v9 }
 0x1c6   : > { %v1528_v49 = vmul.f32 %v4106_v63, %v3133_v19  ;;  %v2010_v3 = vadd.f32 %v3902_v40, %v1971_v8  ;;  %v1529_v11 = vmul.f32 %v4115_v33, %v3133_v19  ;;  %v1627_v22 = vrot.slane %v1607_v59, 7 }
 0x1c7   : > { %v1344_v60 = vadd.f32 %v1312_v1, %v1148_v13  ;;  %v2011_v45 = vadd.f32 %v3902_v40, %v1972_v58  ;;  %v1345_v53 = vadd.f32 %v1313_v54, %v1149_v48  ;;  %v1643_v43 = vrot.slane %v1608_v32, 7 }
 0x1c8   : > { %v1659_v18 = vrot.slane %v1609_v21, 7  ;;  %v2042_v62 = vmax.f32 %v2010_v3, 0.0  ;;  %v1793_v38 = vmul.f32 %v3144_v23, %v1607_v59  ;;  %v1794_v56 = vmul.f32 %v3144_v23, %v1608_v32 }
 0x1c9   : > { %v1412_v52 = vadd.f32 %v1380_v27, %v1344_v60  ;;  %v2043_v57 = vmax.f32 %v2011_v45, 0.0  ;;  %v1413_v46 = vadd.f32 %v1381_v10, %v1345_v53  ;;  %v1675_v39 = vsel %vm866_vm4, %v1627_v22, %v1643_v43  ;;  %v1610_v45 = vld [vmem:[#allocation2 + $0x198] sm:$0xff] }
 0x1ca   : > { %v1691_v2 = vsel %vm866_vm4, %v1659_v18, %v1627_v22  ;;  %v1726_v42 = vmul.f32 %v3136_v20, %v1675_v39  ;;  %v1843_v55 = vrot.slane %v1607_v59, 1  ;;  %v1859_v1 = vrot.slane %v1608_v32, 1  ;;  %v1611_v18 = vld [vmem:[#allocation2 + $0x1a0] sm:$0xff] }
 0x1cb   : > { %v1560_v36 = vadd.f32 %v1528_v49, %v1412_v52  ;;  %v1725_v31 = vmul.f32 %v3136_v20, %v1691_v2  ;;  %v2061_v47 = vpack.c.bf16 %v2043_v57, %v2042_v62  ;;  %v1561_v29 = vadd.f32 %v1529_v11, %v1413_v46  ;;  %v1612_v57 = vld [vmem:[#allocation2 + $0x1a8] sm:$0xff] }
 0x1cc   : > { %v1875_v8 = vrot.slane %v1609_v21, 1  ;;  %v933_v54 = vmul.f32 %v4095_v30, %v3072_v35  ;;  %v934_v27 = vmul.f32 %v4089_v15, %v3072_v35  ;;  %v969_v58 = vmul.f32 %v4071_v26, %v3069_v34 }
 0x1cd   : > { %v1757_v13 = vadd.f32 %v1725_v31, %v1560_v36  ;;  %2798 = vmatmul.mubr.msk.bf16.gmra.mrb[8].mxu1 %vm733_vm6, %v2061_v47  ;;  %v1758_v48 = vadd.f32 %v1726_v42, %v1561_v29  ;;  %v1907_v49 = vsel %vm1051_vm5, %v1843_v55, %v1859_v1  ;;  %v970_v21 = vmul.f32 %v4073_v0, %v3069_v34 }
 0x1ce   : > { %v1891_v10 = vsel %vm1051_vm5, %v1859_v1, %v1875_v8  ;;  %v1941_v30 = vmul.f32 %v3865_v61, %v1907_v49  ;;  %v1001_v15 = vadd.f32 %v969_v58, %v933_v54  ;;  %v1118_v11 = vmul.f32 %v4106_v63, %v3083_v44 }
 0x1cf   : > { %v1825_v3 = vadd.f32 %v1793_v38, %v1757_v13  ;;  %v1942_v35 = vmul.f32 %v3865_v61, %v1891_v10  ;;  %v1826_v60 = vadd.f32 %v1794_v56, %v1758_v48  ;;  %v1002_v26 = vadd.f32 %v970_v21, %v934_v27 }
 0x1d0   : > { %v1119_v22 = vmul.f32 %v4115_v33, %v3083_v44  ;;  %v1314_v43 = vmul.f32 %v1691_v2, %v3121_v12  ;;  %v1315_v34 = vmul.f32 %v1675_v39, %v3121_v12  ;;  %v1382_v0 = vmul.f32 %v1607_v59, %v3115_v9 }
 0x1d1   : > { %v1973_v53 = vadd.f32 %v1941_v30, %v1825_v3  ;;  %v1974_v62 = vadd.f32 %v1942_v35, %v1826_v60  ;;  %v1150_v52 = vadd.f32 %v1118_v11, %v1001_v15  ;;  %v1383_v56 = vmul.f32 %v1608_v32, %v3115_v9 }
 0x1d2   : > { %v1151_v38 = vadd.f32 %v1119_v22, %v1002_v26  ;;  %v1530_v46 = vmul.f32 %v1907_v49, %v3133_v19  ;;  %v1531_v44 = vmul.f32 %v1891_v10, %v3133_v19  ;;  %v1628_v33 = vrot.slane %v1610_v45, 7 }
 0x1d3   : > { %v2012_v63 = vadd.f32 %v3902_v40, %v1973_v53  ;;  %v2013_v2 = vadd.f32 %v3902_v40, %v1974_v62  ;;  %v1346_v36 = vadd.f32 %v1314_v43, %v1150_v52  ;;  %v1644_v39 = vrot.slane %v1611_v18, 7 }
 0x1d4   : > { %v1347_v12 = vadd.f32 %v1315_v34, %v1151_v38  ;;  %v1660_v31 = vrot.slane %v1612_v57, 7  ;;  %v1795_v42 = vmul.f32 %v3144_v23, %v1610_v45  ;;  %v1796_v55 = vmul.f32 %v3144_v23, %v1611_v18 }
 0x1d5   : > { %v2044_v59 = vmax.f32 %v2012_v63, 0.0  ;;  %v2045_v9 = vmax.f32 %v2013_v2, 0.0  ;;  %v1414_v32 = vadd.f32 %v1382_v0, %v1346_v36  ;;  %v1676_v29 = vsel %vm866_vm4, %v1628_v33, %v1644_v39 }
 0x1d6   : > { %v1415_v47 = vadd.f32 %v1383_v56, %v1347_v12  ;;  %v1692_v19 = vsel %vm866_vm4, %v1660_v31, %v1628_v33  ;;  %v1728_v1 = vmul.f32 %v3136_v20, %v1676_v29  ;;  %v1844_v8 = vrot.slane %v1610_v45, 1 }
 0x1d7   : > { %v1860_v13 = vrot.slane %v1611_v18, 1  ;;  %v2062_v54 = vpack.c.bf16 %v2045_v9, %v2044_v59  ;;  %v1562_v27 = vadd.f32 %v1530_v46, %v1414_v32  ;;  %v1727_v48 = vmul.f32 %v3136_v20, %v1692_v19  ;;  %v2151_v20 = vpop.f32.mrb[45].mxu0 }
 0x1d8   : > { %v1563_v58 = vadd.f32 %v1531_v44, %v1415_v47  ;;  %v1876_v10 = vrot.slane %v1612_v57, 1  ;;  %v4197_v22 = vpop.f32.mrb[46].mxu0 }
 0x1d9   : > { %v1908_v23 = vsel %vm1051_vm5, %v1844_v8, %v1860_v13  ;;  %2801 = vmatprep.mubr.msk.bf16.mxu1 %vm733_vm6, %v2062_v54  ;;  %v1759_v49 = vadd.f32 %v1727_v48, %v1562_v27  ;;  %v4201_v43 = vpop.f32.mrb[47].mxu0 }
 0x1da   : > { %v1760_v21 = vadd.f32 %v1728_v1, %v1563_v58  ;;  %v1943_v3 = vmul.f32 %v3865_v61, %v1908_v23  ;;  %v1892_v30 = vsel %vm1051_vm5, %v1860_v13, %v1876_v10 }
 0x1db   : > { %v1827_v35 = vadd.f32 %v1795_v42, %v1759_v49  ;;  %v1944_v60 = vmul.f32 %v3865_v61, %v1892_v30  ;;  %v4207_v61 = vld [vmem:[%s4330_s7] ss:$0 sm:$0xff] }
 0x1dc   : > { %v1828_v15 = vadd.f32 %v1796_v55, %v1760_v21 }
 0x1dd   : > { %v1975_v26 = vadd.f32 %v1943_v3, %v1827_v35 }
 0x1de   : > { %v1976_v11 = vadd.f32 %v1944_v60, %v1828_v15 }
 0x1df   : > { %v2014_v45 = vadd.f32 %v3902_v40, %v1975_v26 }
 0x1e0   : > { %v2015_v53 = vadd.f32 %v3902_v40, %v1976_v11 }
 0x1e1   : > { %v2046_v34 = vmax.f32 %v2014_v45, 0.0 }
 0x1e2   : > { %v2047_v0 = vmax.f32 %v2015_v53, 0.0 }
 0x1e4   : > { %v2063_v24 = vpack.c.bf16 %v2047_v0, %v2046_v34 }
 0x1e6   : > { %2802 = vmatmul.mubr.msk.bf16.gmra.mrb[12].mxu1 %vm733_vm6, %v2063_v24 }
 0x209   : > { %v2775_v18 = vpop.f32.mrb[16].mxu1 }
 0x20a   : > { %v2325_v62 = vadd.f32 %v2775_v18, %v3662_v7  ;;  %v2316_v40 = vpop.f32.mrb[17].mxu1 }
 0x20b   : > { %v2317_v52 = vadd.f32 %v2316_v40, %v3871_v51  ;;  %v2776_v38 = vpop.f32.mrb[18].mxu1 }
 0x20c   : > { %v2452_v56 = vadd.f32 %v4207_v61, %v2325_v62  ;;  %v2328_v57 = vadd.f32 %v2776_v38, %v3877_v25  ;;  %v2319_v63 = vpop.f32.mrb[19].mxu1 }
 0x20d   : > { %v2450_v46 = vadd.f32 %v4207_v61, %v2317_v52  ;;  %v2320_v44 = vadd.f32 %v2319_v63, %v3885_v4 }
 0x20e   : > { %2485 = vst.msk [vmem:[%s2940_s15 + $0x10] sm:$0xff] %vm2482_vm7, %v2452_v56  ;;  %v2453_v33 = vadd.f32 %v4207_v61, %v2328_v57 }
 0x20f   : > { %2483 = vst.msk [vmem:[%s2940_s15] sm:$0xff] %vm2482_vm7, %v2450_v46  ;;  %v2451_v7 = vadd.f32 %v4207_v61, %v2320_v44 }
 0x210   : > { %2486 = vst.msk [vmem:[%s2940_s15 + $0x18] sm:$0xff] %vm2482_vm7, %v2453_v33 }
 0x211   : > { %2484 = vst.msk [vmem:[%s2940_s15 + $0x8] sm:$0xff] %vm2482_vm7, %v2451_v7 }
 0x226   : > { %v2779_v51 = vpop.f32.mrb[20].mxu1 }
 0x227   : > { %v2341_v25 = vadd.f32 %v2779_v51, %v3893_v5  ;;  %v2332_v4 = vpop.f32.mrb[21].mxu1 }
 0x228   : > { %v2333_v2 = vadd.f32 %v2332_v4, %v4018_v17  ;;  %v2780_v36 = vpop.f32.mrb[22].mxu1 }
 0x229   : > { %v2456_v12 = vadd.f32 %v4207_v61, %v2341_v25  ;;  %v2344_v39 = vadd.f32 %v2780_v36, %v4025_v14  ;;  %v2335_v59 = vpop.f32.mrb[23].mxu1 }
 0x22a   : > { %v2454_v31 = vadd.f32 %v4207_v61, %v2333_v2  ;;  %v2336_v42 = vadd.f32 %v2335_v59, %v4030_v6 }
 0x22b   : > { %2489 = vst.msk [vmem:[%s2940_s15 + $0x30] sm:$0xff] %vm2482_vm7, %v2456_v12  ;;  %v2457_v55 = vadd.f32 %v4207_v61, %v2344_v39 }
 0x22c   : > { %2487 = vst.msk [vmem:[%s2940_s15 + $0x20] sm:$0xff] %vm2482_vm7, %v2454_v31  ;;  %v2455_v5 = vadd.f32 %v4207_v61, %v2336_v42 }
 0x22d   : > { %2490 = vst.msk [vmem:[%s2940_s15 + $0x38] sm:$0xff] %vm2482_vm7, %v2457_v55 }
 0x22e   : > { %2488 = vst.msk [vmem:[%s2940_s15 + $0x28] sm:$0xff] %vm2482_vm7, %v2455_v5 }
 0x240   : > { %v2783_v17 = vpop.f32.mrb[24].mxu1 }
 0x241   : > { %v2357_v14 = vadd.f32 %v2783_v17, %v4036_v28  ;;  %v2348_v6 = vpop.f32.mrb[25].mxu1 }
 0x242   : > { %v2349_v9 = vadd.f32 %v2348_v6, %v4138_v16  ;;  %v2784_v32 = vpop.f32.mrb[26].mxu1 }
 0x243   : > { %v2460_v47 = vadd.f32 %v4207_v61, %v2357_v14  ;;  %v2360_v29 = vadd.f32 %v2784_v32, %v4141_v37  ;;  %v2351_v19 = vpop.f32.mrb[27].mxu1 }
 0x244   : > { %v2458_v1 = vadd.f32 %v4207_v61, %v2349_v9  ;;  %v2352_v8 = vadd.f32 %v2351_v19, %v4145_v50 }
 0x245   : > { %2493 = vst.msk [vmem:[%s2940_s15 + $0x50] sm:$0xff] %vm2482_vm7, %v2460_v47  ;;  %v2461_v13 = vadd.f32 %v4207_v61, %v2360_v29 }
 0x246   : > { %2491 = vst.msk [vmem:[%s2940_s15 + $0x40] sm:$0xff] %vm2482_vm7, %v2458_v1  ;;  %v2459_v28 = vadd.f32 %v4207_v61, %v2352_v8 }
 0x247   : > { %2494 = vst.msk [vmem:[%s2940_s15 + $0x58] sm:$0xff] %vm2482_vm7, %v2461_v13 }
 0x248   : > { %2492 = vst.msk [vmem:[%s2940_s15 + $0x48] sm:$0xff] %vm2482_vm7, %v2459_v28 }
 0x258   : > { %v2787_v16 = vpop.f32.mrb[28].mxu1 }
 0x259   : > { %v2373_v37 = vadd.f32 %v2787_v16, %v4151_v41  ;;  %v2364_v50 = vpop.f32.mrb[29].mxu1 }
 0x25a   : > { %v2365_v54 = vadd.f32 %v2364_v50, %v2151_v20  ;;  %v2788_v27 = vpop.f32.mrb[30].mxu1 }
 0x25b   : > { %v2464_v58 = vadd.f32 %v4207_v61, %v2373_v37  ;;  %v2376_v48 = vadd.f32 %v2788_v27, %v4197_v22  ;;  %v2367_v10 = vpop.f32.mrb[31].mxu1 }
 0x25c   : > { %v2462_v23 = vadd.f32 %v4207_v61, %v2365_v54  ;;  %v2368_v49 = vadd.f32 %v2367_v10, %v4201_v43 }
 0x25d   : > { %2497 = vst.msk [vmem:[%s2940_s15 + $0x70] sm:$0xff] %vm2482_vm7, %v2464_v58  ;;  %v2465_v21 = vadd.f32 %v4207_v61, %v2376_v48 }
 0x25e   : > { %2495 = vst.msk [vmem:[%s2940_s15 + $0x60] sm:$0xff] %vm2482_vm7, %v2462_v23  ;;  %v2463_v41 = vadd.f32 %v4207_v61, %v2368_v49 }
 0x25f   : > { %2498 = vst.msk [vmem:[%s2940_s15 + $0x78] sm:$0xff] %vm2482_vm7, %v2465_v21 }
 0x260   : > { %2496 = vst.msk [vmem:[%s2940_s15 + $0x68] sm:$0xff] %vm2482_vm7, %v2463_v41 }
 0x26f   : > { %v2791_v3 = vpop.f32.mrb[0].mxu1 }
 0x270   : > { %v2468_v30 = vadd.f32 %v2791_v3, %v4207_v61  ;;  %v2380_v35 = vpop.f32.mrb[1].mxu1 }
 0x271   : > { %v2466_v15 = vadd.f32 %v4207_v61, %v2380_v35  ;;  %v2792_v60 = vpop.f32.mrb[2].mxu1 }
 0x272   : > { %2501 = vst.msk [vmem:[%s2940_s15 + $0x90] sm:$0xff] %vm2482_vm7, %v2468_v30  ;;  %v2469_v26 = vadd.f32 %v2792_v60, %v4207_v61  ;;  %v2383_v11 = vpop.f32.mrb[3].mxu1 }
 0x273   : > { %2499 = vst.msk [vmem:[%s2940_s15 + $0x80] sm:$0xff] %vm2482_vm7, %v2466_v15  ;;  %v2467_v20 = vadd.f32 %v4207_v61, %v2383_v11 }
 0x274   : > { %2502 = vst.msk [vmem:[%s2940_s15 + $0x98] sm:$0xff] %vm2482_vm7, %v2469_v26 }
 0x275   : > { %2500 = vst.msk [vmem:[%s2940_s15 + $0x88] sm:$0xff] %vm2482_vm7, %v2467_v20 }
 0x288   : > { %v2795_v22 = vpop.f32.mrb[4].mxu1 }
 0x289   : > { %v2472_v45 = vadd.f32 %v2795_v22, %v4207_v61  ;;  %v2396_v53 = vpop.f32.mrb[5].mxu1 }
 0x28a   : > { %v2470_v43 = vadd.f32 %v4207_v61, %v2396_v53  ;;  %v2796_v34 = vpop.f32.mrb[6].mxu1 }
 0x28b   : > { %2505 = vst.msk [vmem:[%s2940_s15 + $0xb0] sm:$0xff] %vm2482_vm7, %v2472_v45  ;;  %v2473_v0 = vadd.f32 %v2796_v34, %v4207_v61  ;;  %v2399_v24 = vpop.f32.mrb[7].mxu1 }
 0x28c   : > { %2503 = vst.msk [vmem:[%s2940_s15 + $0xa0] sm:$0xff] %vm2482_vm7, %v2470_v43  ;;  %v2471_v18 = vadd.f32 %v4207_v61, %v2399_v24 }
 0x28d   : > { %2506 = vst.msk [vmem:[%s2940_s15 + $0xb8] sm:$0xff] %vm2482_vm7, %v2473_v0 }
 0x28e   : > { %2504 = vst.msk [vmem:[%s2940_s15 + $0xa8] sm:$0xff] %vm2482_vm7, %v2471_v18 }
 0x2a0   : > { %v2799_v62 = vpop.f32.mrb[8].mxu1 }
 0x2a1   : > { %v2476_v40 = vadd.f32 %v2799_v62, %v4207_v61  ;;  %v2412_v52 = vpop.f32.mrb[9].mxu1 }
 0x2a2   : > { %v2474_v38 = vadd.f32 %v4207_v61, %v2412_v52  ;;  %v2800_v56 = vpop.f32.mrb[10].mxu1 }
 0x2a3   : > { %2509 = vst.msk [vmem:[%s2940_s15 + $0xd0] sm:$0xff] %vm2482_vm7, %v2476_v40  ;;  %v2477_v57 = vadd.f32 %v2800_v56, %v4207_v61  ;;  %v2415_v63 = vpop.f32.mrb[11].mxu1 }
 0x2a4   : > { %2507 = vst.msk [vmem:[%s2940_s15 + $0xc0] sm:$0xff] %vm2482_vm7, %v2474_v38  ;;  %v2475_v46 = vadd.f32 %v4207_v61, %v2415_v63 }
 0x2a5   : > { %2510 = vst.msk [vmem:[%s2940_s15 + $0xd8] sm:$0xff] %vm2482_vm7, %v2477_v57 }
 0x2a6   : > { %2508 = vst.msk [vmem:[%s2940_s15 + $0xc8] sm:$0xff] %vm2482_vm7, %v2475_v46 }
 0x2b9   : > { %v2803_v44 = vpop.f32.mrb[12].mxu1 }
 0x2ba   : > { %v2480_v33 = vadd.f32 %v2803_v44, %v4207_v61  ;;  %v2428_v7 = vpop.f32.mrb[13].mxu1 }
 0x2bb   : > { %v2478_v51 = vadd.f32 %v4207_v61, %v2428_v7  ;;  %v2804_v25 = vpop.f32.mrb[14].mxu1 }
 0x2bc   : > { %2513 = vst.msk [vmem:[%s2940_s15 + $0xf0] sm:$0xff] %vm2482_vm7, %v2480_v33  ;;  %v2481_v4 = vadd.f32 %v2804_v25, %v4207_v61  ;;  %v2431_v2 = vpop.f32.mrb[15].mxu1 }
 0x2bd   : > { %2511 = vst.msk [vmem:[%s2940_s15 + $0xe0] sm:$0xff] %vm2482_vm7, %v2478_v51  ;;  %v2479_v36 = vadd.f32 %v4207_v61, %v2431_v2 }
 0x2be   : > { %2514 = vst.msk [vmem:[%s2940_s15 + $0xf8] sm:$0xff] %vm2482_vm7, %v2481_v4 }
 0x2bf   : > { %2512 = vst.msk [vmem:[%s2940_s15 + $0xe8] sm:$0xff] %vm2482_vm7, %v2479_v36 }
 0x2c0 PF: > { %s18_s27 = sadd.s32 1, %s2876_s27  }
 0x2c1   : > { %p15_p5 = scmp.ge.s32.totalorder %s18_s27, 4  }
 0x2c3   :  { %17 = sbr.rel (!%p15_p5) target bundleno = 1 (0x1), region = 88 }

</bundles_post_ra>
